<compile_context>
chip_gen: v5e
topology: v5e:2x2
jax: 0.10.0
libtpu: 0.0.40
codegen_flags: <defaults>
</compile_context>

<pallas_src>
import jax
import jax.numpy as jnp
from jax.experimental import pallas as pl
from jax.experimental.pallas import tpu as pltpu

D_IN, H1, H2, H3, D_OUT = 4, 256, 128, 64, 1
K_PAD = 8  # layer-1 contraction dim padded 4 -> 8 (sublane-aligned MXU K)


def _round_up(n, m):
    return ((n + m - 1) // m) * m


def mlp_kernel(xT_ref, w1_ref, w2_ref, w3_ref, pk_ref, o_ref):
    # xT_ref : (8, Bt)     input, batch on the lane axis, features padded 4->8
    # w1_ref : (256, 8)    layer-1 weight, K zero-padded 4->8
    # w2_ref : (128, 256)  PyTorch layout (out_features, in_features)
    # w3_ref : (64, 128)
    # pk_ref : (256, 8)    col0=b1, col1=b2, col2=b3, col3=b4, col4=w4
    # o_ref  : (1, Bt)     lane-dense output
    pk = pk_ref[...]

    # --- Layer 1 on the MXU: (256,8) @ (8,Bt).  Padded K columns are zero.
    h = jnp.dot(w1_ref[...], xT_ref[...], preferred_element_type=jnp.float32)
    h = jnp.maximum(h + pk[:, 0:1], 0.0)                   # (256, Bt)

    # --- Layer 2: (128,256) @ (256,Bt) on the MXU.
    h = jnp.dot(w2_ref[...], h, preferred_element_type=jnp.float32)
    h = jnp.maximum(h + pk[0:H2, 1:2], 0.0)                # (128, Bt)

    # --- Layer 3: (64,128) @ (128,Bt) on the MXU.
    h = jnp.dot(w3_ref[...], h, preferred_element_type=jnp.float32)
    h = jnp.maximum(h + pk[0:H3, 2:3], 0.0)                # (64, Bt)

    # --- Layer 4 (N=1): VPU mul + sublane (XLU) reduction -> lane-dense (1, Bt).
    w4_col = pk[0:H3, 4:5]                                 # (64, 1)
    out = jnp.sum(h * w4_col, axis=0, keepdims=True) + pk[0:1, 3:4]
    o_ref[...] = out.astype(o_ref.dtype)


def _pack_small_params(b1, b2, b3, b4, w4):
    """Pack the 4 biases and the (1,64) last-layer weight into one (256,8)
    f32 buffer (single small DMA instead of five sub-KiB ones)."""
    pk = jnp.zeros((H1, 8), jnp.float32)
    pk = pk.at[:, 0].set(b1.reshape(H1))
    pk = pk.at[:H2, 1].set(b2.reshape(H2))
    pk = pk.at[:H3, 2].set(b3.reshape(H3))
    pk = pk.at[0, 3].set(b4.reshape(()))
    pk = pk.at[:H3, 4].set(w4.reshape(H3))
    return pk


def regression_model_forward(x, params, *, b_tile=4096):
    """x: (B, 4) float32.  params: PyTorch-layout (w, b) pairs.  Returns (B, 1).

    b_tile: max batch-tile size (lane axis).  4096 keeps peak VMEM ~7-8 MiB,
    which fits the default scoped-VMEM limit on v5e/v6e/v7x; the effective
    tile is auto-capped by the batch and is always a multiple of 256.
    """
    (w1, b1, w2, b2, w3, b3, w4, b4) = params
    B = x.shape[0]
    b_tile = max(256, (b_tile // 256) * 256)       # enforce multiple of 256
    bt = min(b_tile, _round_up(B, 256))            # auto-cap by batch size
    B_pad = _round_up(B, bt)

    # Single host-side materialization: batch -> lane axis, contraction dim
    # zero-padded 4 -> 8 so layer 1 is an aligned MXU matmul.
    xT = jnp.zeros((K_PAD, B_pad), jnp.float32).at[:D_IN, :B].set(x.T)
    w1p = jnp.zeros((H1, K_PAD), jnp.float32).at[:, :D_IN].set(w1)
    pk = _pack_small_params(b1, b2, b3, b4, w4)

    const = lambda i: (0, 0)  # weights stay VMEM-resident across the batch grid
    out = pl.pallas_call(
        mlp_kernel,
        out_shape=jax.ShapeDtypeStruct((1, B_pad), jnp.float32),
        grid=(B_pad // bt,),
        in_specs=[
            pl.BlockSpec((K_PAD, bt), lambda i: (0, i)),   # x tile (pipelined)
            pl.BlockSpec((H1, K_PAD), const),              # w1 (K padded to 8)
            pl.BlockSpec((H2, H1), const),                 # w2
            pl.BlockSpec((H3, H2), const),                 # w3
            pl.BlockSpec((H1, 8), const),                  # packed biases + w4
        ],
        out_specs=pl.BlockSpec((1, bt), lambda i: (0, i)),
        compiler_params=pltpu.CompilerParams(
            dimension_semantics=("parallel",)),
    )(xT, w1p, w2, w3, pk)
    return out.reshape(B_pad, 1)[:B]


def init_params(key):
    """nn.Linear-style U(-1/sqrt(fan_in), 1/sqrt(fan_in)) init, PyTorch weight
    layout (out_features, in_features)."""
    dims = [(D_IN, H1), (H1, H2), (H2, H3), (H3, D_OUT)]
    params = []
    for fan_in, fan_out in dims:
        key, kw, kb = jax.random.split(key, 3)
        bound = 1.0 / jnp.sqrt(fan_in)
        w = jax.random.uniform(kw, (fan_out, fan_in), jnp.float32, -bound, bound)
        b = jax.random.uniform(kb, (fan_out,), jnp.float32, -bound, bound)
        params.extend([w, b])
    return tuple(params)


def reference_forward(x, params):
    (w1, b1, w2, b2, w3, b3, w4, b4) = params
    h = jnp.maximum(x @ w1.T + b1, 0.0)
    h = jnp.maximum(h @ w2.T + b2, 0.0)
    h = jnp.maximum(h @ w3.T + b3, 0.0)
    return h @ w4.T + b4


if __name__ == "__main__":
    key = jax.random.PRNGKey(0)
    key, kx = jax.random.split(key)
    params = init_params(key)

    # Small demo batch (single grid step, tile auto-capped to 256).
    batch = 8
    x = jax.random.normal(kx, (batch, D_IN), dtype=jnp.float32)
    out = jax.block_until_ready(regression_model_forward(x, params))
    ref = reference_forward(x, params)
    assert out.shape == (batch, 1), out.shape
    assert jnp.allclose(out, ref, atol=1e-4, rtol=1e-4), "mismatch vs reference (B=8)"

    # Non-multiple batch with a forced small tile: exercises the multi-step
    # batch grid, VMEM-resident weights, and the zero-padded tail path.
    key, kx2 = jax.random.split(key)
    batch2 = 300
    x2 = jax.random.normal(kx2, (batch2, D_IN), dtype=jnp.float32)
    out2 = jax.block_until_ready(regression_model_forward(x2, params, b_tile=256))
    ref2 = reference_forward(x2, params)
    assert out2.shape == (batch2, 1), out2.shape
    assert jnp.allclose(out2, ref2, atol=1e-4, rtol=1e-4), "mismatch vs reference (B=300)"

    print("KERNEL_OK")
</pallas_src>

<mosaic_0001>
module attributes {stable_mosaic.version = 11 : i64} {
  func.func @mlp_kernel(%arg0: i32, %arg1: memref<8x256xf32, #tpu.memory_space<vmem>>, %arg2: memref<256x8xf32, #tpu.memory_space<vmem>>, %arg3: memref<128x256xf32, #tpu.memory_space<vmem>>, %arg4: memref<64x128xf32, #tpu.memory_space<vmem>>, %arg5: memref<256x8xf32, #tpu.memory_space<vmem>>, %arg6: memref<1x256xf32, #tpu.memory_space<vmem>>) attributes {dimension_semantics = [#tpu.dimension_semantics<parallel>], iteration_bounds = array<i64: 1>, scalar_prefetch = 0 : i64, scratch_operands = 0 : i64, tpu.core_type = #tpu.core_type<tc>, window_params = [{transform_indices = @transform_0, window_bounds = array<i64: 8, 256>}, {pipeline_mode = #tpu.pipeline_mode<synchronous>, transform_indices = @transform_1, window_bounds = array<i64: 256, 8>}, {pipeline_mode = #tpu.pipeline_mode<synchronous>, transform_indices = @transform_2, window_bounds = array<i64: 128, 256>}, {pipeline_mode = #tpu.pipeline_mode<synchronous>, transform_indices = @transform_3, window_bounds = array<i64: 64, 128>}, {pipeline_mode = #tpu.pipeline_mode<synchronous>, transform_indices = @transform_4, window_bounds = array<i64: 256, 8>}, {transform_indices = @transform_5, window_bounds = array<i64: 1, 256>}]} {
    %c0 = arith.constant 0 : index
    %c0_0 = arith.constant 0 : index
    %0 = vector.load %arg5[%c0, %c0_0] : memref<256x8xf32, #tpu.memory_space<vmem>>, vector<256x8xf32>
    %c0_1 = arith.constant 0 : index
    %c0_2 = arith.constant 0 : index
    %1 = vector.load %arg2[%c0_1, %c0_2] : memref<256x8xf32, #tpu.memory_space<vmem>>, vector<256x8xf32>
    %c0_3 = arith.constant 0 : index
    %c0_4 = arith.constant 0 : index
    %2 = vector.load %arg1[%c0_3, %c0_4] : memref<8x256xf32, #tpu.memory_space<vmem>>, vector<8x256xf32>
    %cst = arith.constant dense<0.000000e+00> : vector<256x256xf32>
    %3 = tpu.matmul %1, %2, %cst {dimension_numbers = #tpu.dot_dimension_numbers<[1], [0], [0], [1], [0, 0, 1, 1], [], []>} : vector<256x8xf32>, vector<8x256xf32>, vector<256x256xf32> -> vector<256x256xf32>
    %4 = vector.extract_strided_slice %0 {offsets = [0, 0], sizes = [256, 1], strides = [1, 1]} : vector<256x8xf32> to vector<256x1xf32>
    %5 = vector.broadcast %4 : vector<256x1xf32> to vector<256x256xf32>
    %6 = arith.addf %3, %5 : vector<256x256xf32>
    %cst_5 = arith.constant 0.000000e+00 : f32
    %7 = vector.broadcast %cst_5 : f32 to vector<256x256xf32>
    %8 = arith.maximumf %6, %7 : vector<256x256xf32>
    %c0_6 = arith.constant 0 : index
    %c0_7 = arith.constant 0 : index
    %9 = vector.load %arg3[%c0_6, %c0_7] : memref<128x256xf32, #tpu.memory_space<vmem>>, vector<128x256xf32>
    %cst_8 = arith.constant dense<0.000000e+00> : vector<128x256xf32>
    %10 = tpu.matmul %9, %8, %cst_8 {dimension_numbers = #tpu.dot_dimension_numbers<[1], [0], [0], [1], [0, 0, 1, 1], [], []>} : vector<128x256xf32>, vector<256x256xf32>, vector<128x256xf32> -> vector<128x256xf32>
    %11 = vector.extract_strided_slice %0 {offsets = [0, 1], sizes = [128, 1], strides = [1, 1]} : vector<256x8xf32> to vector<128x1xf32>
    %12 = vector.broadcast %11 : vector<128x1xf32> to vector<128x256xf32>
    %13 = arith.addf %10, %12 : vector<128x256xf32>
    %cst_9 = arith.constant 0.000000e+00 : f32
    %14 = vector.broadcast %cst_9 : f32 to vector<128x256xf32>
    %15 = arith.maximumf %13, %14 : vector<128x256xf32>
    %c0_10 = arith.constant 0 : index
    %c0_11 = arith.constant 0 : index
    %16 = vector.load %arg4[%c0_10, %c0_11] : memref<64x128xf32, #tpu.memory_space<vmem>>, vector<64x128xf32>
    %cst_12 = arith.constant dense<0.000000e+00> : vector<64x256xf32>
    %17 = tpu.matmul %16, %15, %cst_12 {dimension_numbers = #tpu.dot_dimension_numbers<[1], [0], [0], [1], [0, 0, 1, 1], [], []>} : vector<64x128xf32>, vector<128x256xf32>, vector<64x256xf32> -> vector<64x256xf32>
    %18 = vector.extract_strided_slice %0 {offsets = [0, 2], sizes = [64, 1], strides = [1, 1]} : vector<256x8xf32> to vector<64x1xf32>
    %19 = vector.broadcast %18 : vector<64x1xf32> to vector<64x256xf32>
    %20 = arith.addf %17, %19 : vector<64x256xf32>
    %cst_13 = arith.constant 0.000000e+00 : f32
    %21 = vector.broadcast %cst_13 : f32 to vector<64x256xf32>
    %22 = arith.maximumf %20, %21 : vector<64x256xf32>
    %23 = vector.extract_strided_slice %0 {offsets = [0, 4], sizes = [64, 1], strides = [1, 1]} : vector<256x8xf32> to vector<64x1xf32>
    %24 = vector.broadcast %23 : vector<64x1xf32> to vector<64x256xf32>
    %25 = arith.mulf %22, %24 : vector<64x256xf32>
    %cst_14 = arith.constant dense<0.000000e+00> : vector<256xf32>
    %26 = vector.multi_reduction <add>, %25, %cst_14 [0] : vector<64x256xf32> to vector<256xf32>
    %27 = vector.shape_cast %26 : vector<256xf32> to vector<1x256xf32>
    %28 = vector.extract_strided_slice %0 {offsets = [0, 3], sizes = [1, 1], strides = [1, 1]} : vector<256x8xf32> to vector<1x1xf32>
    %29 = vector.broadcast %28 : vector<1x1xf32> to vector<1x256xf32>
    %30 = arith.addf %27, %29 : vector<1x256xf32>
    %c0_15 = arith.constant 0 : index
    %c0_16 = arith.constant 0 : index
    %31 = vector.load %arg6[%c0_15, %c0_16] : memref<1x256xf32, #tpu.memory_space<vmem>>, vector<1x256xf32>
    tpu.vector_store %arg6[%c0_15, %c0_16], %30 {strides = array<i32>} : memref<1x256xf32, #tpu.memory_space<vmem>>, vector<1x256xf32>,
    return
  }
  func.func @transform_0(%arg0: i32) -> (i32, i32) {
    %c0_i32 = arith.constant 0 : i32
    %c0_i32_0 = arith.constant 0 : i32
    return %c0_i32, %arg0 : i32, i32
  }
  func.func @transform_1(%arg0: i32) -> (i32, i32) {
    %c0_i32 = arith.constant 0 : i32
    %c0_i32_0 = arith.constant 0 : i32
    %c0_i32_1 = arith.constant 0 : i32
    return %c0_i32, %c0_i32_0 : i32, i32
  }
  func.func @transform_2(%arg0: i32) -> (i32, i32) {
    %c0_i32 = arith.constant 0 : i32
    %c0_i32_0 = arith.constant 0 : i32
    %c0_i32_1 = arith.constant 0 : i32
    return %c0_i32, %c0_i32_0 : i32, i32
  }
  func.func @transform_3(%arg0: i32) -> (i32, i32) {
    %c0_i32 = arith.constant 0 : i32
    %c0_i32_0 = arith.constant 0 : i32
    %c0_i32_1 = arith.constant 0 : i32
    return %c0_i32, %c0_i32_0 : i32, i32
  }
  func.func @transform_4(%arg0: i32) -> (i32, i32) {
    %c0_i32 = arith.constant 0 : i32
    %c0_i32_0 = arith.constant 0 : i32
    %c0_i32_1 = arith.constant 0 : i32
    return %c0_i32, %c0_i32_0 : i32, i32
  }
  func.func @transform_5(%arg0: i32) -> (i32, i32) {
    %c0_i32 = arith.constant 0 : i32
    %c0_i32_0 = arith.constant 0 : i32
    return %c0_i32, %arg0 : i32, i32
  }
}

</mosaic_0001>

<bundles_post_ra>
// kernel: tpu_custom_call.1
= control target key start
LH: loop header
LB: loop body
LE: loop exit
PB: predicated region body
PF: predicated region fallthrough
CT: control target
= control target key end

     0   :  { %vm247_vm0 = vcmask 64512   ;;  %v1420_v3 = vmov 0   ;;  %s2489_s0 = inlined_call_operand.vmem [shape: f32[8,256], index: 0, kind: input, shape index: {}]   ;;  %s2490_s1 = inlined_call_operand.vmem [shape: f32[256,8], index: 1, kind: input, shape index: {}]   ;;  %s2491_s2 = inlined_call_operand.vmem [shape: f32[128,256], index: 2, kind: input, shape index: {}]   ;;  %s2492_s3 = inlined_call_operand.vmem [shape: f32[64,128], index: 3, kind: input, shape index: {}]   ;;  %s2493_s4 = inlined_call_operand.vmem [shape: f32[256,8], index: 4, kind: input, shape index: {}]   ;;  %s2494_s5 = inlined_call_operand.hbm [shape: f32[1,256], index: 5, kind: output, shape index: {}]  }
   0x1   :  { %v85_v0 = vld [vmem:[%s2489_s0] sm:$0xff]  ;;  %v86_v1 = vld [vmem:[%s2489_s0 + $0x8] sm:$0xff]  ;;  %1371 = vset.pattern.permute.xlu2 %v1420_v3  ;;  %1370 = vset.pattern.permute.xlu1 %v1420_v3  ;;  %v52_v4 = vld [vmem:[%s2493_s4 + $0xf8] sm:$0xff] }
   0x2   :  { %v53_v2 = vld [vmem:[%s2490_s1] sm:$0xff]  ;;  %1369 = vset.pattern.permute.xlu0 %v1420_v3  ;;  %359 = vmatpush.msra.mxu0 %v85_v0  ;;  %v51_v5 = vld [vmem:[%s2493_s4 + $0xf0] sm:$0xff]  ;;  %v1474_v6 = vld [vmem:[%s2493_s4 + $0x78] sm:$0xff] }
   0x3   :  { %472 = vmatpush.msra.mxu1 %v86_v1  ;;  %1267 = vmatmul.msk.f32.vlgmr.msra.gmra.mxu0 %vm247_vm0, %v53_v2 }
   0x4   :  { %1299 = vmatmul.msk.f32.vlgmr.msra.gmra.mxu1 %vm247_vm0, %v53_v2  ;;  %244 = vperm.xlu1 %1370, %v52_v4  }
   0x5   :  { %239 = vperm.xlu2 %1371, %v51_v5   ;;  %164 = vperm.xlu0 %1369, %v1474_v6  }
   0x6   :  { %10 = vsyncpa [#allocation3], 0  ;;  %v54_v7 = vld [vmem:[%s2490_s1 + $0x8] sm:$0xff]  ;;  %v1490_v9 = vld [vmem:[%s2493_s4 + $0x70] sm:$0xff]  ;;  %s1258_s8 = sshll.u32 %s2494_s5, 4  ;;  %vm1243_vm1 = vcmask 1040384   ;;  %s1259_s8 = int_to_ptr.hbm [resolvable:$true] %s1258_s8 }
   0x7   :  { %v1485_v8 = vld [vmem:[%s2493_s4 + $0x68] sm:$0xff]  ;;  %v1495_v10 = vld [vmem:[%s2493_s4 + $0x60] sm:$0xff]  ;;  %v55_v11 = vld [vmem:[%s2490_s1 + $0x10] sm:$0xff] }
   0x8   :  { %v1508_v12 = vld [vmem:[%s2493_s4 + $0x58] sm:$0xff]  ;;  %v50_v13 = vld [vmem:[%s2493_s4 + $0xe8] sm:$0xff]  ;;  %v49_v14 = vld [vmem:[%s2493_s4 + $0xe0] sm:$0xff] }
   0x9   :  { %v56_v15 = vld [vmem:[%s2490_s1 + $0x18] sm:$0xff]  ;;  %v1528_v17 = vld [vmem:[%s2493_s4 + $0x50] sm:$0xff]  ;;  %v1533_v18 = vld [vmem:[%s2493_s4 + $0x48] sm:$0xff] }
   0xa   :  { %v48_v16 = vld [vmem:[%s2493_s4 + $0xd8] sm:$0xff]  ;;  %2511 = vst [vmem:[#allocation5_spill] sm:$0xff] %v1528_v17  ;;  %v57_v19 = vld [vmem:[%s2490_s1 + $0x20] sm:$0xff]  ;;  %v47_v21 = vld [vmem:[%s2493_s4 + $0xd0] sm:$0xff] }
   0xb   :  { %1268 = vmatmul.msk.f32.gmra.mxu0 %vm247_vm0, %v54_v7  ;;  %v1545_v20 = vld [vmem:[%s2493_s4 + $0x40] sm:$0xff]  ;;  %v46_v22 = vld [vmem:[%s2493_s4 + $0xc8] sm:$0xff]  ;;  %v1565_v25 = vld [vmem:[%s2493_s4 + $0x38] sm:$0xff] }
   0xc   :  { %1300 = vmatmul.msk.f32.gmra.mxu1 %vm247_vm0, %v54_v7  ;;  %154 = vperm.xlu1 %1370, %v1485_v8   ;;  %2512 = vst [vmem:[#allocation6_spill] sm:$0xff] %v1545_v20  ;;  %v58_v23 = vld [vmem:[%s2490_s1 + $0x28] sm:$0xff]  ;;  %v45_v24 = vld [vmem:[%s2493_s4 + $0xc0] sm:$0xff]  ;;  %v1570_v26 = vld [vmem:[%s2493_s4 + $0x30] sm:$0xff] }
   0xd   :  { %159 = vperm.xlu0 %1369, %v1490_v9   ;;  %149 = vperm.xlu2 %1371, %v1495_v10   ;;  %2513 = vst [vmem:[#allocation7_spill] sm:$0xff] %v1565_v25  ;;  %v59_v27 = vld [vmem:[%s2490_s1 + $0x30] sm:$0xff]  ;;  %v1582_v28 = vld [vmem:[%s2493_s4 + $0x28] sm:$0xff]  ;;  %v44_v29 = vld [vmem:[%s2493_s4 + $0xb8] sm:$0xff] }
   0xe   :  { %2514 = vst [vmem:[#allocation8_spill] sm:$0xff] %v1582_v28  ;;  %v43_v30 = vld [vmem:[%s2493_s4 + $0xb0] sm:$0xff]  ;;  %v60_v31 = vld [vmem:[%s2490_s1 + $0x38] sm:$0xff]  ;;  %v42_v32 = vld [vmem:[%s2493_s4 + $0xa8] sm:$0xff] }
   0xf   :  { %v1602_v33 = vld [vmem:[%s2493_s4 + $0x20] sm:$0xff]  ;;  %v1607_v34 = vld [vmem:[%s2493_s4 + $0x18] sm:$0xff]  ;;  %v1619_v36 = vld [vmem:[%s2493_s4 + $0x10] sm:$0xff] }
  0x10   :  { %2515 = vst [vmem:[#allocation9_spill] sm:$0xff] %v1602_v33  ;;  %v61_v35 = vld [vmem:[%s2490_s1 + $0x40] sm:$0xff]  ;;  %v40_v38 = vld [vmem:[%s2493_s4 + $0x98] sm:$0xff]  ;;  %v62_v39 = vld [vmem:[%s2490_s1 + $0x48] sm:$0xff] }
  0x11   :  { %2516 = vst [vmem:[#allocation10_spill] sm:$0xff] %v1607_v34  ;;  %v41_v37 = vld [vmem:[%s2493_s4 + $0xa0] sm:$0xff]  ;;  %v1636_v40 = vld [vmem:[%s2493_s4 + $0x8] sm:$0xff]  ;;  %v63_v42 = vld [vmem:[%s2490_s1 + $0x50] sm:$0xff] }
  0x12   :  { %2517 = vst [vmem:[#allocation11_spill] sm:$0xff] %v1619_v36  ;;  %v1641_v41 = vld [vmem:[%s2493_s4] sm:$0xff]  ;;  %v64_v43 = vld [vmem:[%s2490_s1 + $0x58] sm:$0xff]  ;;  %v39_v45 = vld [vmem:[%s2493_s4 + $0x90] sm:$0xff] }
  0x13   :  { %1269 = vmatmul.msk.f32.gmra.mxu0 %vm247_vm0, %v55_v11  ;;  %2518 = vst [vmem:[#allocation12_spill] sm:$0xff] %v1636_v40  ;;  %v65_v44 = vld [vmem:[%s2490_s1 + $0x60] sm:$0xff]  ;;  %v66_v46 = vld [vmem:[%s2490_s1 + $0x68] sm:$0xff]  ;;  %v67_v48 = vld [vmem:[%s2490_s1 + $0x70] sm:$0xff] }
  0x14   :  { %1301 = vmatmul.msk.f32.gmra.mxu1 %vm247_vm0, %v55_v11  ;;  %144 = vperm.xlu1 %1370, %v1508_v12   ;;  %2519 = vst [vmem:[#allocation13_spill] sm:$0xff] %v1641_v41  ;;  %v37_v47 = vld [vmem:[%s2493_s4 + $0x80] sm:$0xff]  ;;  %v38_v49 = vld [vmem:[%s2493_s4 + $0x88] sm:$0xff]  ;;  %v68_v50 = vld [vmem:[%s2490_s1 + $0x78] sm:$0xff] }
  0x15   :  { %234 = vperm.xlu0 %1369, %v50_v13   ;;  %229 = vperm.xlu2 %1371, %v49_v14   ;;  %v69_v52 = vld [vmem:[%s2490_s1 + $0x80] sm:$0xff]  ;;  %v70_v55 = vld [vmem:[%s2490_s1 + $0x88] sm:$0xff]  ;;  %v71_v58 = vld [vmem:[%s2490_s1 + $0x90] sm:$0xff] }
  0x16   :  { %v72_v61 = vld [vmem:[%s2490_s1 + $0x98] sm:$0xff]  ;;  %v73_v0 = vld [vmem:[%s2490_s1 + $0xa0] sm:$0xff]  ;;  %v74_v3 = vld [vmem:[%s2490_s1 + $0xa8] sm:$0xff] }
  0x17   :  { %v75_v7 = vld [vmem:[%s2490_s1 + $0xb0] sm:$0xff] }
  0x1b   :  { %1270 = vmatmul.msk.f32.gmra.mxu0 %vm247_vm0, %v56_v15 }
  0x1c   :  { %1302 = vmatmul.msk.f32.gmra.mxu1 %vm247_vm0, %v56_v15  ;;  %224 = vperm.xlu1 %1370, %v48_v16   ;;  %v76_v16 = vld [vmem:[%s2490_s1 + $0xb8] sm:$0xff] }
  0x1d   :  { %139 = vperm.xlu0 %1369, %v1528_v17   ;;  %134 = vperm.xlu2 %1371, %v1533_v18  }
  0x23   :  { %1271 = vmatmul.msk.f32.gmra.mxu0 %vm247_vm0, %v57_v19 }
  0x24   :  { %1303 = vmatmul.msk.f32.gmra.mxu1 %vm247_vm0, %v57_v19  ;;  %129 = vperm.xlu1 %1370, %v1545_v20  }
  0x25   :  { %219 = vperm.xlu0 %1369, %v47_v21   ;;  %214 = vperm.xlu2 %1371, %v46_v22  }
  0x2b   :  { %1272 = vmatmul.msk.f32.gmra.mxu0 %vm247_vm0, %v58_v23 }
  0x2c   :  { %1304 = vmatmul.msk.f32.gmra.mxu1 %vm247_vm0, %v58_v23  ;;  %209 = vperm.xlu1 %1370, %v45_v24   ;;  %v77_v24 = vld [vmem:[%s2490_s1 + $0xc0] sm:$0xff] }
  0x2d   :  { %124 = vperm.xlu0 %1369, %v1565_v25   ;;  %119 = vperm.xlu2 %1371, %v1570_v26  }
  0x33   :  { %1273 = vmatmul.msk.f32.gmra.mxu0 %vm247_vm0, %v59_v27 }
  0x34   :  { %1305 = vmatmul.msk.f32.gmra.mxu1 %vm247_vm0, %v59_v27  ;;  %114 = vperm.xlu1 %1370, %v1582_v28  }
  0x35   :  { %204 = vperm.xlu0 %1369, %v44_v29   ;;  %199 = vperm.xlu2 %1371, %v43_v30  }
  0x3b   :  { %1274 = vmatmul.msk.f32.gmra.mxu0 %vm247_vm0, %v60_v31 }
  0x3c   :  { %1306 = vmatmul.msk.f32.gmra.mxu1 %vm247_vm0, %v60_v31  ;;  %194 = vperm.xlu1 %1370, %v42_v32   ;;  %v78_v32 = vld [vmem:[%s2490_s1 + $0xc8] sm:$0xff] }
  0x3d   :  { %109 = vperm.xlu0 %1369, %v1602_v33   ;;  %104 = vperm.xlu2 %1371, %v1607_v34  }
  0x43   :  { %1275 = vmatmul.msk.f32.gmra.mxu0 %vm247_vm0, %v61_v35 }
  0x44   :  { %1307 = vmatmul.msk.f32.gmra.mxu1 %vm247_vm0, %v61_v35  ;;  %99 = vperm.xlu1 %1370, %v1619_v36  }
  0x45   :  { %189 = vperm.xlu0 %1369, %v41_v37   ;;  %184 = vperm.xlu2 %1371, %v40_v38  }
  0x4b   :  { %1276 = vmatmul.msk.f32.gmra.mxu0 %vm247_vm0, %v62_v39 }
  0x4c   :  { %1308 = vmatmul.msk.f32.gmra.mxu1 %vm247_vm0, %v62_v39  ;;  %179 = vperm.xlu1 %1370, %v39_v45  }
  0x4d   :  { %94 = vperm.xlu0 %1369, %v1636_v40   ;;  %89 = vperm.xlu2 %1371, %v1641_v41   ;;  %v83_v40 = vld [vmem:[%s2490_s1 + $0xf0] sm:$0xff] }
  0x53   :  { %1277 = vmatmul.msk.f32.gmra.mxu0 %vm247_vm0, %v63_v42 }
  0x54   :  { %1309 = vmatmul.msk.f32.gmra.mxu1 %vm247_vm0, %v63_v42  ;;  %169 = vperm.xlu1 %1370, %v37_v47   ;;  %v79_v42 = vld [vmem:[%s2490_s1 + $0xd0] sm:$0xff] }
  0x55   :  { %174 = vperm.xlu0 %1369, %v38_v49  }
  0x5b   :  { %1278 = vmatmul.msk.f32.gmra.mxu0 %vm247_vm0, %v64_v43 }
  0x5c   :  { %1310 = vmatmul.msk.f32.gmra.mxu1 %vm247_vm0, %v64_v43 }
  0x5f   :  { %v1751_v14 = vpop.permute.xlu2 %239 }
  0x63   :  { %1279 = vmatmul.msk.f32.gmra.mxu0 %vm247_vm0, %v65_v44 }
  0x64   :  { %1311 = vmatmul.msk.f32.gmra.mxu1 %vm247_vm0, %v65_v44 }
  0x67   :  { %v1773_v29 = vpop.permute.xlu2 %149 }
  0x6b   :  { %1280 = vmatmul.msk.f32.gmra.mxu0 %vm247_vm0, %v66_v46 }
  0x6c   :  { %1312 = vmatmul.msk.f32.gmra.mxu1 %vm247_vm0, %v66_v46 }
  0x6f   :  { %v1789_v38 = vpop.permute.xlu2 %229 }
  0x70   :  { %2520 = vst [vmem:[#allocation14_spill] sm:$0xff] %v1789_v38 }
  0x73   :  { %1281 = vmatmul.msk.f32.gmra.mxu0 %vm247_vm0, %v67_v48 }
  0x74   :  { %1313 = vmatmul.msk.f32.gmra.mxu1 %vm247_vm0, %v67_v48  ;;  %v80_v48 = vld [vmem:[%s2490_s1 + $0xd8] sm:$0xff] }
  0x76   :  { %v1762_v21 = vpop.permute.xlu1 %244 }
  0x77   :  { %v1749_v13 = vpop.permute.xlu0 %164  ;;  %v1803_v46 = vpop.permute.xlu2 %134 }
  0x7b   :  { %1282 = vmatmul.msk.f32.gmra.mxu0 %vm247_vm0, %v68_v50 }
  0x7c   :  { %1314 = vmatmul.msk.f32.gmra.mxu1 %vm247_vm0, %v68_v50 }
  0x7e   :  { %v1777_v30 = vpop.permute.xlu1 %154 }
  0x7f   :  { %v1764_v22 = vpop.permute.xlu0 %159 }
  0x80   :  { %v1686_v51 = vpop.f32.mrf.mxu0 }
  0x81   :  { %v1691_v53 = vpop.f32.mrf.mxu1 }
  0x83   :  { %1283 = vmatmul.msk.f32.gmra.mxu0 %vm247_vm0, %v69_v52 }
  0x84   :  { %1315 = vmatmul.msk.f32.gmra.mxu1 %vm247_vm0, %v69_v52 }
  0x86   :  { %v1797_v44 = vpop.permute.xlu1 %144 }
  0x87   :  { %v1786_v37 = vpop.permute.xlu0 %234 }
  0x88   :  { %v1695_v54 = vpop.f32.mrf.mxu0 }
  0x89   :  { %v1700_v56 = vpop.f32.mrf.mxu1 }
  0x8b   :  { %1284 = vmatmul.msk.f32.gmra.mxu0 %vm247_vm0, %v70_v55 }
  0x8c   :  { %1316 = vmatmul.msk.f32.gmra.mxu1 %vm247_vm0, %v70_v55  ;;  %v1816_v55 = vpop.permute.xlu2 %214 }
  0x8d   :  { %2523 = vst [vmem:[#allocation17_spill] sm:$0xff] %v1816_v55 }
  0x8e   :  { %v1811_v50 = vpop.permute.xlu1 %224 }
  0x8f   :  { %v1800_v45 = vpop.permute.xlu0 %139  ;;  %2521 = vst [vmem:[#allocation15_spill] sm:$0xff] %v1811_v50 }
  0x90   :  { %v1704_v57 = vpop.f32.mrf.mxu0 }
  0x91   :  { %v1709_v59 = vpop.f32.mrf.mxu1 }
  0x93   :  { %1285 = vmatmul.msk.f32.gmra.mxu0 %vm247_vm0, %v71_v58 }
  0x94   :  { %1317 = vmatmul.msk.f32.gmra.mxu1 %vm247_vm0, %v71_v58 }
  0x97   :  { %v1814_v52 = vpop.permute.xlu0 %219 }
  0x98   :  { %v1713_v60 = vpop.f32.mrf.mxu0  ;;  %2522 = vst [vmem:[#allocation16_spill] sm:$0xff] %v1814_v52 }
  0x99   :  { %v1718_v62 = vpop.f32.mrf.mxu1 }
  0x9b   :  { %1286 = vmatmul.msk.f32.gmra.mxu0 %vm247_vm0, %v72_v61 }
  0x9c   :  { %1318 = vmatmul.msk.f32.gmra.mxu1 %vm247_vm0, %v72_v61  ;;  %v81_v61 = vld [vmem:[%s2490_s1 + $0xe0] sm:$0xff] }
  0xa0   :  { %v1722_v63 = vpop.f32.mrf.mxu0 }
  0xa1   :  { %v1727_v1 = vpop.f32.mrf.mxu1 }
  0xa3   :  { %1287 = vmatmul.msk.f32.gmra.mxu0 %vm247_vm0, %v73_v0 }
  0xa4   :  { %1319 = vmatmul.msk.f32.gmra.mxu1 %vm247_vm0, %v73_v0 }
  0xa8   :  { %v1731_v2 = vpop.f32.mrf.mxu0 }
  0xa9   :  { %v1736_v4 = vpop.f32.mrf.mxu1 }
  0xab   :  { %1288 = vmatmul.msk.f32.gmra.mxu0 %vm247_vm0, %v74_v3 }
  0xac   :  { %1320 = vmatmul.msk.f32.gmra.mxu1 %vm247_vm0, %v74_v3  ;;  %v1825_v3 = vpop.permute.xlu1 %129 }
  0xb0   :  { %v1740_v5 = vpop.f32.mrf.mxu0 }
  0xb1   :  { %v1745_v11 = vpop.f32.mrf.mxu1 }
  0xb3   :  { %1289 = vmatmul.msk.f32.gmra.mxu0 %vm247_vm0, %v75_v7 }
  0xb4   :  { %1321 = vmatmul.msk.f32.gmra.mxu1 %vm247_vm0, %v75_v7  ;;  %v1827_v7 = vpop.permute.xlu0 %124 }
  0xb8   :  { %v1753_v15 = vpop.f32.mrf.mxu0 }
  0xb9   :  { %v1758_v19 = vpop.f32.mrf.mxu1 }
  0xbb   :  { %1290 = vmatmul.msk.f32.gmra.mxu0 %vm247_vm0, %v76_v16 }
  0xbc   :  { %1322 = vmatmul.msk.f32.gmra.mxu1 %vm247_vm0, %v76_v16  ;;  %v1845_v36 = vpop.permute.xlu0 %204 }
  0xbd   :  { %2525 = vst [vmem:[#allocation19_spill] sm:$0xff] %v1845_v36 }
  0xc0   :  { %v1766_v23 = vpop.f32.mrf.mxu0 }
  0xc1   :  { %v1771_v27 = vpop.f32.mrf.mxu1 }
  0xc3   :  { %1291 = vmatmul.msk.f32.gmra.mxu0 %vm247_vm0, %v77_v24 }
  0xc4   :  { %1323 = vmatmul.msk.f32.gmra.mxu1 %vm247_vm0, %v77_v24  ;;  %v82_v24 = vld [vmem:[%s2490_s1 + $0xe8] sm:$0xff] }
  0xc8   :  { %v1779_v31 = vpop.f32.mrf.mxu0 }
  0xc9   :  { %v1784_v35 = vpop.f32.mrf.mxu1 }
  0xcb   :  { %1292 = vmatmul.msk.f32.gmra.mxu0 %vm247_vm0, %v78_v32 }
  0xcc   :  { %1324 = vmatmul.msk.f32.gmra.mxu1 %vm247_vm0, %v78_v32 }
  0xd0   :  { %v391_v39 = vpop.f32.mrf.mxu0 }
  0xd1   :  { %v1795_v43 = vpop.f32.mrf.mxu1 }
  0xd3   :  { %1293 = vmatmul.msk.f32.gmra.mxu0 %vm247_vm0, %v79_v42 }
  0xd4   :  { %1325 = vmatmul.msk.f32.gmra.mxu1 %vm247_vm0, %v79_v42  ;;  %v1834_v42 = vpop.permute.xlu2 %119 }
  0xd8   :  { %v394_v47 = vpop.f32.mrf.mxu0 }
  0xd9   :  { %v1808_v49 = vpop.f32.mrf.mxu1 }
  0xdb   :  { %1294 = vmatmul.msk.f32.gmra.mxu0 %vm247_vm0, %v80_v48 }
  0xdc   :  { %1326 = vmatmul.msk.f32.gmra.mxu1 %vm247_vm0, %v80_v48  ;;  %v1838_v48 = vpop.permute.xlu1 %209  ;;  %v1848_v41 = vpop.permute.xlu2 %199 }
  0xdd   :  { %2524 = vst [vmem:[#allocation18_spill] sm:$0xff] %v1838_v48 }
  0xde   :  { %2526 = vst [vmem:[#allocation20_spill] sm:$0xff] %v1848_v41  ;;  %v1860_v41 = vpop.permute.xlu0 %109 }
  0xe0   :  { %v397_v58 = vpop.f32.mrf.mxu0 }
  0xe1   :  { %v1821_v0 = vpop.f32.mrf.mxu1 }
  0xe3   :  { %1295 = vmatmul.msk.f32.gmra.mxu0 %vm247_vm0, %v81_v61 }
  0xe4   :  { %1327 = vmatmul.msk.f32.gmra.mxu1 %vm247_vm0, %v81_v61  ;;  %v1856_v55 = vpop.permute.xlu1 %114  ;;  %v1864_v17 = vpop.permute.xlu2 %104 }
  0xe8   :  { %v400_v16 = vpop.f32.mrf.mxu0 }
  0xe9   :  { %v1832_v32 = vpop.f32.mrf.mxu1  ;;  %v401_v36 = vadd.f32 %v400_v16, %v1777_v30  ;;  %v392_v16 = vadd.f32 %v391_v39, %v1800_v45  ;;  %v383_v39 = vadd.f32 %v1753_v15, %v1827_v7  ;;  %v374_v15 = vadd.f32 %v1722_v63, %v1860_v41 }
  0xeb   :  { %1296 = vmatmul.msk.f32.gmra.mxu0 %vm247_vm0, %v82_v24 }
  0xec   :  { %1328 = vmatmul.msk.f32.gmra.mxu1 %vm247_vm0, %v82_v24  ;;  %v84_v24 = vld [vmem:[%s2490_s1 + $0xf8] sm:$0xff] }
  0xf0   :  { %v403_v61 = vpop.f32.mrf.mxu0 }
  0xf1   :  { %v1843_v33 = vpop.f32.mrf.mxu1  ;;  %v404_v48 = vadd.f32 %v403_v61, %v1764_v22  ;;  %v395_v61 = vadd.f32 %v394_v47, %v1797_v44  ;;  %v386_v47 = vadd.f32 %v1766_v23, %v1825_v3 }
  0xf3   :  { %1297 = vmatmul.msk.f32.gmra.mxu0 %vm247_vm0, %v83_v40  ;;  %v598_v50 = vmax.f32 %v404_v48, 0.0  ;;  %v586_v23 = vmax.f32 %v386_v47, 0.0 }
  0xf4   :  { %1329 = vmatmul.msk.f32.gmra.mxu1 %vm247_vm0, %v83_v40  ;;  %v398_v40 = vadd.f32 %v397_v58, %v1773_v29  ;;  %v592_v58 = vmax.f32 %v395_v61, 0.0 }
  0xf8   :  { %v406_v25 = vpop.f32.mrf.mxu0 }
  0xf9   :  { %v519_v28 = vpop.f32.mrf.mxu1  ;;  %v407_v34 = vadd.f32 %v406_v25, %v1749_v13  ;;  %v596_v25 = vmax.f32 %v401_v36, 0.0  ;;  %v590_v36 = vmax.f32 %v392_v16, 0.0  ;;  %v377_v16 = vadd.f32 %v1731_v2, %v1856_v55 }
  0xfa   :  { %v578_v2 = vmax.f32 %v374_v15, 0.0  ;;  %v514_v15 = vadd.f32 %v1832_v32, %v1777_v30  ;;  %v502_v32 = vadd.f32 %v1784_v35, %v1803_v46 }
  0xfb   :  { %1298 = vmatmul.msk.f32.gmra.mxu0 %vm247_vm0, %v84_v24  ;;  %v600_v52 = vmax.f32 %v407_v34, 0.0  ;;  %v594_v34 = vmax.f32 %v398_v40, 0.0  ;;  %v1882_v40 = vpop.permute.xlu2 %184 }
  0xfc   :  { %1330 = vmatmul.msk.f32.gmra.mxu1 %vm247_vm0, %v84_v24  ;;  %v389_v24 = vadd.f32 %v1779_v31, %v1803_v46  ;;  %v380_v31 = vadd.f32 %v1740_v5, %v1834_v42  ;;  %v580_v5 = vmax.f32 %v377_v16, 0.0 }
  0xfd   :  { %730 = vmatpush.msra.mxu2 %v600_v52  ;;  %v1874_v52 = vpop.permute.xlu1 %194 }
  0xfe   :  { %v588_v48 = vmax.f32 %v389_v24, 0.0  ;;  %v582_v24 = vmax.f32 %v380_v31, 0.0 }
  0xff   :  { %731 = vmatpush.msra.mxu2 %v598_v50  ;;  %v1878_v50 = vpop.permute.xlu0 %189 }
 0x100   :  { %v1867_v38 = vpop.f32.mrf.mxu0 }
 0x101   :  { %v1870_v20 = vpop.f32.mrf.mxu1  ;;  %732 = vmatpush.msra.mxu2 %v596_v25 }
 0x102   :  { %2527 = vst [vmem:[#allocation21_spill] sm:$0xff] %v1870_v20 }
 0x103   :  { %733 = vmatpush.msra.mxu2 %v594_v34  ;;  %v584_v34 = vmax.f32 %v383_v39, 0.0 }
 0x105   :  { %734 = vmatpush.msra.mxu2 %v592_v58  ;;  %v100_v58 = vpop.permute.xlu1 %99 }
 0x106   :  { %v368_v47 = vadd.f32 %v1704_v57, %v100_v58 }
 0x107   :  { %735 = vmatpush.msra.mxu2 %v590_v36  ;;  %v371_v36 = vadd.f32 %v1713_v60, %v1864_v17  ;;  %v95_v20 = vpop.permute.xlu0 %94 }
 0x108   :  { %v1884_v25 = vpop.f32.mrf.mxu0  ;;  %v365_v63 = vadd.f32 %v1695_v54, %v95_v20  ;;  %v574_v16 = vmax.f32 %v368_v47, 0.0 }
 0x109   :  { %v1888_v61 = vpop.f32.mrf.mxu1  ;;  %736 = vmatpush.msra.mxu2 %v588_v48  ;;  %v90_v48 = vpop.permute.xlu2 %89  ;;  %v576_v31 = vmax.f32 %v371_v36, 0.0 }
 0x10a   :  { %2528 = vst [vmem:[#allocation22_spill] sm:$0xff] %v1888_v61  ;;  %v362_v60 = vadd.f32 %v1686_v51, %v90_v48  ;;  %v572_v57 = vmax.f32 %v365_v63, 0.0  ;;  %v508_v51 = vadd.f32 %v1808_v49, %v1797_v44  ;;  %v496_v49 = vadd.f32 %v1758_v19, %v1827_v7 }
 0x10b   :  { %737 = vmatpush.msra.mxu2 %v586_v23  ;;  %v520_v23 = vadd.f32 %v519_v28, %v1749_v13  ;;  %v511_v28 = vadd.f32 %v1821_v0, %v1773_v29  ;;  %v499_v0 = vadd.f32 %v1771_v27, %v1825_v3  ;;  %v490_v27 = vadd.f32 %v1736_v4, %v1856_v55 }
 0x10c   :  { %v570_v54 = vmax.f32 %v362_v60, 0.0  ;;  %v593_v29 = vmax.f32 %v508_v51, 0.0  ;;  %v585_v63 = vmax.f32 %v496_v49, 0.0  ;;  %v487_v19 = vadd.f32 %v1727_v1, %v1860_v41  ;;  %v1963_v51 = vld [vmem:[%s2491_s2] sm:$0xff]  ;;  %v2532_v49 = vld [vmem:[#allocation15_spill] sm:$0xff] }
 0x10d   :  { %738 = vmatpush.msra.mxu2 %v584_v34  ;;  %v517_v34 = vadd.f32 %v1843_v33, %v1764_v22  ;;  %v597_v33 = vmax.f32 %v514_v15, 0.0  ;;  %v505_v22 = vadd.f32 %v1795_v43, %v1800_v45  ;;  %v595_v30 = vmax.f32 %v511_v28, 0.0 }
 0x10e   :  { %v493_v43 = vadd.f32 %v1745_v11, %v1834_v42  ;;  %v587_v35 = vmax.f32 %v499_v0, 0.0  ;;  %v484_v11 = vadd.f32 %v1718_v62, %v1864_v17  ;;  %v581_v7 = vmax.f32 %v490_v27, 0.0 }
 0x10f   :  { %739 = vmatpush.msra.mxu2 %v582_v24  ;;  %v601_v24 = vmax.f32 %v520_v23, 0.0  ;;  %v599_v13 = vmax.f32 %v517_v34, 0.0  ;;  %v591_v44 = vmax.f32 %v505_v22, 0.0  ;;  %v481_v42 = vadd.f32 %v1709_v59, %v100_v58 }
 0x110   :  { %v1896_v61 = vpop.f32.mrf.mxu0  ;;  %v583_v3 = vmax.f32 %v493_v43, 0.0  ;;  %v579_v60 = vmax.f32 %v487_v19, 0.0  ;;  %v478_v4 = vadd.f32 %v1700_v56, %v95_v20  ;;  %v577_v55 = vmax.f32 %v484_v11, 0.0  ;;  %v2534_v19 = vld [vmem:[#allocation17_spill] sm:$0xff] }
 0x111   :  { %740 = vmatpush.msra.mxu2 %v580_v5  ;;  %v1899_v39 = vpop.f32.mrf.mxu1  ;;  %v475_v41 = vadd.f32 %v1691_v53, %v90_v48  ;;  %v575_v1 = vmax.f32 %v481_v42, 0.0  ;;  %v1421_v28 = vmov 1   ;;  %v2535_v42 = vld [vmem:[#allocation10_spill] sm:$0xff] }
 0x112   :  { %v573_v17 = vmax.f32 %v478_v4, 0.0  ;;  %1373 = vset.pattern.permute.xlu0 %v1421_v28  ;;  %1374 = vset.pattern.permute.xlu1 %v1421_v28  ;;  %v2537_v4 = vld [vmem:[#allocation18_spill] sm:$0xff] }
 0x113   :  { %741 = vmatpush.msra.mxu2 %v578_v2  ;;  %v589_v2 = vmax.f32 %v502_v32, 0.0  ;;  %723 = vperm.xlu0 %1373, %v1490_v9  }
 0x114   :  { %719 = vperm.xlu1 %1374, %v1485_v8   ;;  %1372 = vset.pattern.permute.xlu2 %v1421_v28 }
 0x115   :  { %742 = vmatpush.msra.mxu2 %v576_v31  ;;  %727 = vperm.xlu2 %1372, %v1474_v6   ;;  %v1974_v6 = vld [vmem:[%s2491_s2 + $0x10] sm:$0xff] }
 0x117   :  { %743 = vmatpush.msra.mxu2 %v574_v16  ;;  %v571_v16 = vmax.f32 %v475_v41, 0.0 }
 0x118   :  { %v1908_v5 = vpop.f32.mrf.mxu0 }
 0x119   :  { %744 = vmatpush.msra.mxu2 %v572_v57  ;;  %v1914_v36 = vpop.f32.mrf.mxu1 }
 0x11b   :  { %745 = vmatpush.msra.mxu2 %v570_v54  ;;  %703 = vperm.xlu0 %1373, %v1533_v18  }
 0x11c   :  { %746 = vmatmul.f32.vlgmr.msra.gmra.mxu2 %v1963_v51  ;;  %711 = vperm.xlu1 %1374, %v1508_v12   ;;  %v2530_v12 = vld [vmem:[#allocation14_spill] sm:$0xff] }
 0x11d   :  { %860 = vmatpush.msrb.mxu2 %v601_v24  ;;  %715 = vperm.xlu2 %1372, %v1495_v10   ;;  %v2529_v10 = vld [vmem:[#allocation6_spill] sm:$0xff] }
 0x11f   :  { %861 = vmatpush.msrb.mxu2 %v599_v13 }
 0x120   :  { %v1920_v47 = vpop.f32.mrf.mxu0 }
 0x121   :  { %862 = vmatpush.msrb.mxu2 %v597_v33  ;;  %v1928_v45 = vpop.f32.mrf.mxu1 }
 0x123   :  { %863 = vmatpush.msrb.mxu2 %v595_v30  ;;  %691 = vperm.xlu0 %1373, %v1570_v26   ;;  %v2533_v26 = vld [vmem:[#allocation16_spill] sm:$0xff] }
 0x124   :  { %749 = vmatmul.f32.gmra.mxu2 %v1974_v6  ;;  %699 = vperm.xlu1 %1374, %v2529_v10  }
 0x125   :  { %864 = vmatpush.msrb.mxu2 %v593_v29 }
 0x127   :  { %865 = vmatpush.msrb.mxu2 %v591_v44  ;;  %v2531_v44 = vld [vmem:[#allocation5_spill] sm:$0xff] }
 0x128   :  { %v1930_v46 = vpop.f32.mrf.mxu0  ;;  %707 = vperm.xlu2 %1372, %v2531_v44  }
 0x129   :  { %866 = vmatpush.msrb.mxu2 %v589_v2  ;;  %v1939_v31 = vpop.f32.mrf.mxu1 }
 0x12b   :  { %867 = vmatpush.msrb.mxu2 %v587_v35  ;;  %v1988_v35 = vld [vmem:[%s2491_s2 + $0x20] sm:$0xff]  ;;  %679 = vperm.xlu0 %1373, %v2535_v42   ;;  %v2038_v42 = vld [vmem:[%s2491_s2 + $0x50] sm:$0xff] }
 0x12c   :  { %752 = vmatmul.f32.gmra.mxu2 %v1988_v35 }
 0x12d   :  { %868 = vmatpush.msrb.mxu2 %v585_v63 }
 0x12f   :  { %869 = vmatpush.msrb.mxu2 %v583_v3 }
 0x130   :  { %v1941_v23 = vpop.f32.mrf.mxu0 }
 0x131   :  { %870 = vmatpush.msrb.mxu2 %v581_v7  ;;  %v1945_v59 = vpop.f32.mrf.mxu1 }
 0x133   :  { %871 = vmatpush.msrb.mxu2 %v579_v60  ;;  %v2536_v60 = vld [vmem:[#allocation8_spill] sm:$0xff] }
 0x134   :  { %687 = vperm.xlu1 %1374, %v2536_v60  }
 0x135   :  { %872 = vmatpush.msrb.mxu2 %v577_v55 }
 0x137   :  { %873 = vmatpush.msrb.mxu2 %v575_v1  ;;  %v2538_v1 = vld [vmem:[#allocation7_spill] sm:$0xff] }
 0x138   :  { %v430_v62 = vpop.f32.mrf.mxu0  ;;  %695 = vperm.xlu2 %1372, %v2538_v1  }
 0x139   :  { %874 = vmatpush.msrb.mxu2 %v573_v17  ;;  %v1947_v34 = vpop.f32.mrf.mxu1  ;;  %v2539_v17 = vld [vmem:[#allocation19_spill] sm:$0xff] }
 0x13b   :  { %875 = vmatpush.msrb.mxu2 %v571_v16  ;;  %v431_v16 = vadd.f32 %v430_v62, %v2539_v17  ;;  %v425_v62 = vadd.f32 %v1930_v46, %v1874_v52  ;;  %v2020_v46 = vld [vmem:[%s2491_s2 + $0x40] sm:$0xff] }
 0x13d   :  { %v612_v10 = vmax.f32 %v425_v62, 0.0  ;;  %v2096_v62 = vld [vmem:[%s2491_s2 + $0x80] sm:$0xff] }
 0x140   :  { %v433_v58 = vpop.f32.mrf.mxu0 }
 0x141   :  { %v1949_v15 = vpop.f32.mrf.mxu1  ;;  %v434_v55 = vadd.f32 %v433_v58, %v2537_v4 }
 0x148   :  { %v436_v57 = vpop.f32.mrf.mxu0 }
 0x149   :  { %v1951_v56 = vpop.f32.mrf.mxu1  ;;  %v437_v11 = vadd.f32 %v436_v57, %v2534_v19  ;;  %v2001_v57 = vld [vmem:[%s2491_s2 + $0x30] sm:$0xff] }
 0x14a   :  { %755 = vmatmul.f32.gmra.mxu2 %v2001_v57 }
 0x150   :  { %v439_v20 = vpop.f32.mrf.mxu0 }
 0x151   :  { %v1953_v24 = vpop.f32.mrf.mxu1  ;;  %v440_v27 = vadd.f32 %v439_v20, %v2533_v26  ;;  %v2003_v20 = vpop.permute.xlu1 %179 }
 0x152   :  { %758 = vmatmul.f32.gmra.mxu2 %v2020_v46 }
 0x153   :  { %v622_v41 = vmax.f32 %v440_v27, 0.0 }
 0x158   :  { %v442_v53 = vpop.f32.mrf.mxu0 }
 0x159   :  { %v1957_v13 = vpop.f32.mrf.mxu1  ;;  %v443_v2 = vadd.f32 %v442_v53, %v2532_v49  ;;  %v620_v53 = vmax.f32 %v437_v11, 0.0  ;;  %v2027_v44 = vpop.permute.xlu1 %169  ;;  %v2544_v11 = vld [vmem:[#allocation12_spill] sm:$0xff] }
 0x15a   :  { %v410_v27 = vadd.f32 %v1867_v38, %v2027_v44  ;;  %761 = vmatmul.f32.gmra.mxu2 %v2038_v42  ;;  %v2045_v38 = vld [vmem:[%s2491_s2 + $0x8] sm:$0xff] }
 0x15b   :  { %v624_v7 = vmax.f32 %v443_v2, 0.0 }
 0x15c   :  { %v602_v60 = vmax.f32 %v410_v27, 0.0  ;;  %v2186_v27 = vld [vmem:[%s2491_s2 + $0xf0] sm:$0xff] }
 0x160   :  { %v445_v48 = vpop.f32.mrf.mxu0 }
 0x161   :  { %v1969_v8 = vpop.f32.mrf.mxu1  ;;  %v446_v29 = vadd.f32 %v445_v48, %v2530_v12  ;;  %v2540_v48 = vld [vmem:[#allocation20_spill] sm:$0xff] }
 0x162   :  { %v428_v58 = vadd.f32 %v1941_v23, %v2540_v48  ;;  %v419_v23 = vadd.f32 %v1908_v5, %v1882_v40 }
 0x163   :  { %v626_v3 = vmax.f32 %v446_v29, 0.0  ;;  %v2022_v29 = vpop.permute.xlu0 %174 }
 0x164   :  { %v413_v5 = vadd.f32 %v1884_v25, %v2022_v29  ;;  %v608_v2 = vmax.f32 %v419_v23, 0.0  ;;  %v2132_v23 = vld [vmem:[%s2491_s2 + $0x58] sm:$0xff] }
 0x168   :  { %v448_v54 = vpop.f32.mrf.mxu0 }
 0x169   :  { %v449_v18 = vadd.f32 %v448_v54, %v1786_v37  ;;  %v561_v63 = vpop.f32.mrf.mxu1  ;;  %v618_v54 = vmax.f32 %v434_v55, 0.0 }
 0x16b   :  { %v628_v43 = vmax.f32 %v449_v18, 0.0  ;;  %v614_v18 = vmax.f32 %v428_v58, 0.0 }
 0x170   :  { %v451_v33 = vpop.f32.mrf.mxu0 }
 0x171   :  { %v452_v22 = vadd.f32 %v451_v33, %v1751_v14  ;;  %v564_v28 = vpop.f32.mrf.mxu1  ;;  %v616_v33 = vmax.f32 %v431_v16, 0.0 }
 0x172   :  { %v565_v25 = vadd.f32 %v564_v28, %v1751_v14  ;;  %v556_v14 = vadd.f32 %v1957_v13, %v2532_v49  ;;  %v550_v13 = vadd.f32 %v1951_v56, %v2534_v19  ;;  %v547_v49 = vadd.f32 %v1949_v15, %v2537_v4  ;;  %v2084_v15 = vld [vmem:[%s2491_s2 + $0x28] sm:$0xff] }
 0x173   :  { %v630_v0 = vmax.f32 %v452_v22, 0.0  ;;  %v2542_v22 = vld [vmem:[#allocation11_spill] sm:$0xff]  ;;  %v541_v56 = vadd.f32 %v1945_v59, %v2540_v48  ;;  %v532_v59 = vadd.f32 %v1914_v36, %v1882_v40  ;;  %v2545_v40 = vld [vmem:[#allocation22_spill] sm:$0xff] }
 0x174   :  { %675 = vperm.xlu1 %1374, %v2542_v22   ;;  %v631_v1 = vmax.f32 %v565_v25, 0.0  ;;  %v619_v19 = vmax.f32 %v547_v49, 0.0  ;;  %v526_v36 = vadd.f32 %v2545_v40, %v2022_v29  ;;  %v2144_v29 = vld [vmem:[%s2491_s2 + $0x68] sm:$0xff] }
 0x175   :  { %v615_v28 = vmax.f32 %v541_v56, 0.0 }
 0x178   :  { %v454_v9 = vpop.f32.mrf.mxu0 }
 0x179   :  { %v455_v30 = vadd.f32 %v454_v9, %v1762_v21  ;;  %v2541_v9 = vld [vmem:[#allocation13_spill] sm:$0xff] }
 0x17a   :  { %667 = vperm.xlu0 %1373, %v2541_v9  }
 0x17b   :  { %v632_v32 = vmax.f32 %v455_v30, 0.0  ;;  %v422_v30 = vadd.f32 %v1920_v47, %v1878_v50  ;;  %v416_v47 = vadd.f32 %v1896_v61, %v2003_v20  ;;  %v604_v61 = vmax.f32 %v413_v5, 0.0  ;;  %v2168_v5 = vld [vmem:[%s2491_s2 + $0x88] sm:$0xff] }
 0x17d   :  { %795 = vmatpush.msra.mxu3 %v632_v32  ;;  %v2543_v32 = vld [vmem:[#allocation9_spill] sm:$0xff] }
 0x17e   :  { %683 = vperm.xlu2 %1372, %v2543_v32   ;;  %v2126_v32 = vld [vmem:[%s2491_s2 + $0xa0] sm:$0xff] }
 0x17f   :  { %796 = vmatpush.msra.mxu3 %v630_v0  ;;  %v610_v0 = vmax.f32 %v422_v30, 0.0 }
 0x181   :  { %797 = vmatpush.msra.mxu3 %v628_v43  ;;  %v567_v43 = vpop.f32.mrf.mxu1 }
 0x183   :  { %798 = vmatpush.msra.mxu3 %v626_v3  ;;  %v606_v3 = vmax.f32 %v416_v47, 0.0  ;;  %v2150_v47 = vld [vmem:[%s2491_s2 + $0xc0] sm:$0xff] }
 0x185   :  { %799 = vmatpush.msra.mxu3 %v624_v7  ;;  %v568_v7 = vadd.f32 %v567_v43, %v1762_v21  ;;  %v562_v21 = vadd.f32 %v561_v63, %v1786_v37  ;;  %v553_v37 = vadd.f32 %v1953_v24, %v2533_v26  ;;  %v544_v24 = vadd.f32 %v1947_v34, %v2539_v17  ;;  %v2180_v43 = vld [vmem:[%s2491_s2 + $0x98] sm:$0xff] }
 0x186   :  { %671 = vperm.xlu2 %1372, %v2544_v11   ;;  %v621_v26 = vmax.f32 %v550_v13, 0.0  ;;  %v538_v34 = vadd.f32 %v1939_v31, %v1874_v52  ;;  %v535_v17 = vadd.f32 %v1928_v45, %v1878_v50  ;;  %v529_v52 = vadd.f32 %v1899_v39, %v2003_v20  ;;  %v2104_v50 = vld [vmem:[%s2491_s2 + $0x38] sm:$0xff]  ;;  %v2114_v20 = vld [vmem:[%s2491_s2 + $0x90] sm:$0xff]  ;;  %v2195_v11 = vpop.permute.xlu2 %727 }
 0x187   :  { %800 = vmatpush.msra.mxu3 %v622_v41  ;;  %v633_v55 = vmax.f32 %v568_v7, 0.0  ;;  %v559_v41 = vadd.f32 %v1969_v8, %v2530_v12  ;;  %v629_v16 = vmax.f32 %v562_v21, 0.0  ;;  %v2064_v8 = vld [vmem:[%s2491_s2 + $0x18] sm:$0xff]  ;;  %v625_v12 = vmax.f32 %v556_v14, 0.0 }
 0x188   :  { %v623_v58 = vmax.f32 %v553_v37, 0.0  ;;  %v617_v4 = vmax.f32 %v544_v24, 0.0  ;;  %v613_v48 = vmax.f32 %v538_v34, 0.0  ;;  %v611_v31 = vmax.f32 %v535_v17, 0.0  ;;  %v2201_v7 = vld [vmem:[%s2491_s2 + $0xb8] sm:$0xff] }
 0x189   :  { %801 = vmatpush.msra.mxu3 %v620_v53  ;;  %v2056_v53 = vld [vmem:[%s2491_s2 + $0x60] sm:$0xff]  ;;  %v627_v63 = vmax.f32 %v559_v41, 0.0  ;;  %v609_v45 = vmax.f32 %v532_v59, 0.0  ;;  %v607_v22 = vmax.f32 %v529_v52, 0.0  ;;  %v605_v39 = vmax.f32 %v526_v36, 0.0  ;;  %v2221_v41 = vld [vmem:[%s2491_s2 + $0xd8] sm:$0xff] }
 0x18a   :  { %764 = vmatmul.f32.gmra.mxu2 %v2056_v53 }
 0x18b   :  { %802 = vmatpush.msra.mxu3 %v618_v54  ;;  %v2076_v54 = vld [vmem:[%s2491_s2 + $0x70] sm:$0xff] }
 0x18d   :  { %803 = vmatpush.msra.mxu3 %v616_v33  ;;  %v2546_v33 = vld [vmem:[#allocation21_spill] sm:$0xff] }
 0x18e   :  { %v523_v9 = vadd.f32 %v2546_v33, %v2027_v44  ;;  %v2162_v44 = vld [vmem:[%s2491_s2 + $0xd0] sm:$0xff]  ;;  %v2212_v21 = vpop.permute.xlu2 %715 }
 0x18f   :  { %804 = vmatpush.msra.mxu3 %v614_v18  ;;  %v2120_v18 = vld [vmem:[%s2491_s2 + $0x48] sm:$0xff] }
 0x190   :  { %v603_v30 = vmax.f32 %v523_v9, 0.0 }
 0x191   :  { %805 = vmatpush.msra.mxu3 %v612_v10  ;;  %v2138_v10 = vld [vmem:[%s2491_s2 + $0xb0] sm:$0xff] }
 0x192   :  { %767 = vmatmul.f32.gmra.mxu2 %v2076_v54 }
 0x193   :  { %806 = vmatpush.msra.mxu3 %v610_v0  ;;  %v2156_v0 = vld [vmem:[%s2491_s2 + $0x78] sm:$0xff] }
 0x195   :  { %807 = vmatpush.msra.mxu3 %v608_v2  ;;  %v2174_v2 = vld [vmem:[%s2491_s2 + $0xe0] sm:$0xff] }
 0x197   :  { %808 = vmatpush.msra.mxu3 %v606_v3  ;;  %v2192_v3 = vld [vmem:[%s2491_s2 + $0xa8] sm:$0xff] }
 0x199   :  { %809 = vmatpush.msra.mxu3 %v604_v61  ;;  %v2203_v61 = vpop.permute.xlu0 %723 }
 0x19a   :  { %770 = vmatmul.f32.gmra.mxu2 %v2096_v62 }
 0x19b   :  { %810 = vmatpush.msra.mxu3 %v602_v60  ;;  %v2210_v60 = vld [vmem:[%s2491_s2 + $0xc8] sm:$0xff] }
 0x19c   :  { %811 = vmatmul.f32.vlgmr.msra.gmra.mxu3 %v2045_v38 }
 0x19d   :  { %925 = vmatpush.msrb.mxu3 %v633_v55 }
 0x19f   :  { %926 = vmatpush.msrb.mxu3 %v631_v1  ;;  %v747_v25 = vpop.f32.mrf.mxu2  ;;  %v2225_v1 = vpop.permute.xlu2 %707 }
 0x1a1   :  { %927 = vmatpush.msrb.mxu3 %v629_v16 }
 0x1a2   :  { %773 = vmatmul.f32.gmra.mxu2 %v2114_v20 }
 0x1a3   :  { %928 = vmatpush.msrb.mxu3 %v627_v63 }
 0x1a4   :  { %814 = vmatmul.f32.gmra.mxu3 %v2064_v8 }
 0x1a5   :  { %929 = vmatpush.msrb.mxu3 %v625_v12 }
 0x1a7   :  { %930 = vmatpush.msrb.mxu3 %v623_v58  ;;  %v750_v55 = vpop.f32.mrf.mxu2  ;;  %v2239_v13 = vpop.permute.xlu2 %695 }
 0x1a9   :  { %931 = vmatpush.msrb.mxu3 %v621_v26 }
 0x1aa   :  { %776 = vmatmul.f32.gmra.mxu2 %v2126_v32 }
 0x1ab   :  { %932 = vmatpush.msrb.mxu3 %v619_v19 }
 0x1ac   :  { %817 = vmatmul.f32.gmra.mxu3 %v2084_v15 }
 0x1ad   :  { %933 = vmatpush.msrb.mxu3 %v617_v4 }
 0x1af   :  { %934 = vmatpush.msrb.mxu3 %v615_v28  ;;  %v753_v14 = vpop.f32.mrf.mxu2 }
 0x1b1   :  { %935 = vmatpush.msrb.mxu3 %v613_v48 }
 0x1b2   :  { %779 = vmatmul.f32.gmra.mxu2 %v2138_v10 }
 0x1b3   :  { %936 = vmatpush.msrb.mxu3 %v611_v31 }
 0x1b4   :  { %820 = vmatmul.f32.gmra.mxu3 %v2104_v50 }
 0x1b5   :  { %937 = vmatpush.msrb.mxu3 %v609_v45 }
 0x1b7   :  { %938 = vmatpush.msrb.mxu3 %v607_v22 }
 0x1b9   :  { %939 = vmatpush.msrb.mxu3 %v605_v39 }
 0x1ba   :  { %782 = vmatmul.f32.gmra.mxu2 %v2150_v47 }
 0x1bb   :  { %940 = vmatpush.msrb.mxu3 %v603_v30 }
 0x1bc   :  { %823 = vmatmul.f32.gmra.mxu3 %v2120_v18 }
 0x1c2   :  { %785 = vmatmul.f32.gmra.mxu2 %v2162_v44 }
 0x1c4   :  { %826 = vmatmul.f32.gmra.mxu3 %v2132_v23 }
 0x1ca   :  { %788 = vmatmul.f32.gmra.mxu2 %v2174_v2 }
 0x1cc   :  { %829 = vmatmul.f32.gmra.mxu3 %v2144_v29 }
 0x1cd   :  { %v756_v63 = vpop.f32.mrf.mxu2 }
 0x1d2   :  { %791 = vmatmul.f32.gmra.mxu2 %v2186_v27 }
 0x1d4   :  { %832 = vmatmul.f32.gmra.mxu3 %v2156_v0 }
 0x1d5   :  { %v759_v49 = vpop.f32.mrf.mxu2 }
 0x1d8   :  { %v2252_v24 = vpop.permute.xlu2 %683 }
 0x1da   :  { %876 = vmatmul.f32.vlgmr.msrb.gmra.mxu2 %v1963_v51  ;;  %v2214_v51 = vpop.permute.xlu0 %703 }
 0x1dc   :  { %835 = vmatmul.f32.gmra.mxu3 %v2168_v5 }
 0x1dd   :  { %v762_v56 = vpop.f32.mrf.mxu2 }
 0x1e0   :  { %v2264_v17 = vpop.permute.xlu2 %671 }
 0x1e2   :  { %879 = vmatmul.f32.gmra.mxu2 %v1974_v6  ;;  %v2223_v6 = vpop.permute.xlu1 %719  ;;  %v2228_v16 = vpop.permute.xlu0 %691 }
 0x1e4   :  { %838 = vmatmul.f32.gmra.mxu3 %v2180_v43 }
 0x1ea   :  { %882 = vmatmul.f32.gmra.mxu2 %v1988_v35  ;;  %v2234_v35 = vld [vmem:[%s2491_s2 + $0xe8] sm:$0xff]  ;;  %v2236_v37 = vpop.permute.xlu1 %711  ;;  %v2241_v12 = vpop.permute.xlu0 %679 }
 0x1eb   :  { %v757_v36 = vadd.f32 %v756_v63, %v2241_v12 }
 0x1ec   :  { %841 = vmatmul.f32.gmra.mxu3 %v2192_v3 }
 0x1f2   :  { %885 = vmatmul.f32.gmra.mxu2 %v2001_v57  ;;  %v2247_v57 = vld [vmem:[%s2491_s2 + $0xf8] sm:$0xff]  ;;  %v2250_v58 = vpop.permute.xlu1 %699  ;;  %v2255_v26 = vpop.permute.xlu0 %667 }
 0x1f4   :  { %844 = vmatmul.f32.gmra.mxu3 %v2201_v7 }
 0x1fa   :  { %888 = vmatmul.f32.gmra.mxu2 %v2020_v46  ;;  %v748_v46 = vadd.f32 %v747_v25, %v2255_v26  ;;  %v2259_v34 = vpop.permute.xlu1 %687 }
 0x1fc   :  { %847 = vmatmul.f32.gmra.mxu3 %v2210_v60 }
 0x202   :  { %891 = vmatmul.f32.gmra.mxu2 %v2038_v42  ;;  %v751_v42 = vadd.f32 %v750_v55, %v2264_v17 }
 0x204   :  { %850 = vmatmul.f32.gmra.mxu3 %v2221_v41 }
 0x20a   :  { %894 = vmatmul.f32.gmra.mxu2 %v2056_v53 }
 0x20c   :  { %853 = vmatmul.f32.gmra.mxu3 %v2234_v35 }
 0x20d   :  { %v765_v28 = vpop.f32.mrf.mxu2 }
 0x212   :  { %897 = vmatmul.f32.gmra.mxu2 %v2076_v54 }
 0x214   :  { %856 = vmatmul.f32.gmra.mxu3 %v2247_v57 }
 0x215   :  { %v768_v52 = vpop.f32.mrf.mxu2 }
 0x21a   :  { %900 = vmatmul.f32.gmra.mxu2 %v2096_v62 }
 0x21c   :  { %941 = vmatmul.f32.vlgmr.msrb.gmra.mxu3 %v2045_v38  ;;  %v2271_v38 = vpop.permute.xlu1 %675 }
 0x21d   :  { %v754_v31 = vadd.f32 %v753_v14, %v2271_v38 }
 0x21f   :  { %v812_v19 = vpop.f32.mrf.mxu3 }
 0x220   :  { %v2261_v4 = vadd.f32 %v812_v19, %v748_v46 }
 0x222   :  { %903 = vmatmul.f32.gmra.mxu2 %v2114_v20 }
 0x224   :  { %944 = vmatmul.f32.gmra.mxu3 %v2064_v8  ;;  %v2278_v8 = vpop.f32.mrf.mxu2 }
 0x227   :  { %v815_v59 = vpop.f32.mrf.mxu3 }
 0x228   :  { %v2268_v48 = vadd.f32 %v815_v59, %v751_v42 }
 0x22a   :  { %906 = vmatmul.f32.gmra.mxu2 %v2126_v32  ;;  %v769_v32 = vadd.f32 %v768_v52, %v2239_v13 }
 0x22c   :  { %947 = vmatmul.f32.gmra.mxu3 %v2084_v15  ;;  %v2285_v33 = vpop.f32.mrf.mxu2  ;;  %v760_v15 = vadd.f32 %v759_v49, %v2252_v24 }
 0x22f   :  { %v818_v53 = vpop.f32.mrf.mxu3 }
 0x230   :  { %v2275_v40 = vadd.f32 %v818_v53, %v754_v31 }
 0x232   :  { %909 = vmatmul.f32.gmra.mxu2 %v2138_v10 }
 0x234   :  { %950 = vmatmul.f32.gmra.mxu3 %v2104_v50  ;;  %v777_v62 = vpop.f32.mrf.mxu2  ;;  %v763_v50 = vadd.f32 %v762_v56, %v2259_v34 }
 0x237   :  { %v821_v45 = vpop.f32.mrf.mxu3 }
 0x238   :  { %v2282_v54 = vadd.f32 %v821_v45, %v757_v36  ;;  %v778_v36 = vadd.f32 %v777_v62, %v2225_v1 }
 0x23a   :  { %912 = vmatmul.f32.gmra.mxu2 %v2150_v47 }
 0x23c   :  { %953 = vmatmul.f32.gmra.mxu3 %v2120_v18  ;;  %v780_v20 = vpop.f32.mrf.mxu2  ;;  %v766_v18 = vadd.f32 %v765_v28, %v2228_v16 }
 0x23f   :  { %v824_v9 = vpop.f32.mrf.mxu3 }
 0x240   :  { %v2289_v22 = vadd.f32 %v824_v9, %v760_v15  ;;  %v775_v9 = vadd.f32 %v2285_v33, %v2214_v51 }
 0x242   :  { %915 = vmatmul.f32.gmra.mxu2 %v2162_v44 }
 0x244   :  { %956 = vmatmul.f32.gmra.mxu3 %v2132_v23  ;;  %v783_v23 = vpop.f32.mrf.mxu2 }
 0x247   :  { %v827_v39 = vpop.f32.mrf.mxu3 }
 0x248   :  { %v2294_v30 = vadd.f32 %v827_v39, %v763_v50 }
 0x24a   :  { %918 = vmatmul.f32.gmra.mxu2 %v2174_v2 }
 0x24c   :  { %959 = vmatmul.f32.gmra.mxu3 %v2144_v29  ;;  %v786_v29 = vpop.f32.mrf.mxu2 }
 0x24f   :  { %v830_v25 = vpop.f32.mrf.mxu3 }
 0x250   :  { %v2299_v55 = vadd.f32 %v830_v25, %v766_v18 }
 0x252   :  { %921 = vmatmul.f32.gmra.mxu2 %v2186_v27 }
 0x254   :  { %962 = vmatmul.f32.gmra.mxu3 %v2156_v0  ;;  %v789_v47 = vpop.f32.mrf.mxu2 }
 0x255   :  { %v790_v28 = vadd.f32 %v789_v47, %v2203_v61 }
 0x257   :  { %v833_v14 = vpop.f32.mrf.mxu3 }
 0x258   :  { %v2304_v63 = vadd.f32 %v833_v14, %v769_v32 }
 0x25c   :  { %965 = vmatmul.f32.gmra.mxu3 %v2168_v5  ;;  %v792_v56 = vpop.f32.mrf.mxu2 }
 0x25f   :  { %v836_v10 = vpop.f32.mrf.mxu3 }
 0x264   :  { %968 = vmatmul.f32.gmra.mxu3 %v2180_v43  ;;  %v877_v44 = vpop.f32.mrf.mxu2 }
 0x267   :  { %v839_v49 = vpop.f32.mrf.mxu3 }
 0x26c   :  { %971 = vmatmul.f32.gmra.mxu3 %v2192_v3  ;;  %v880_v19 = vpop.f32.mrf.mxu2  ;;  %v793_v3 = vadd.f32 %v792_v56, %v2195_v11 }
 0x26f   :  { %v842_v0 = vpop.f32.mrf.mxu3 }
 0x270   :  { %v843_v25 = vadd.f32 %v842_v0, %v778_v36 }
 0x272   :  { %v1010_v33 = vmax.f32 %v843_v25, 0.0  ;;  %v1387_v25 = vld [vmem:[%s2493_s4 + $0x10] sm:$0xff] }
 0x274   :  { %974 = vmatmul.f32.gmra.mxu3 %v2201_v7  ;;  %v883_v27 = vpop.f32.mrf.mxu2  ;;  %v787_v7 = vadd.f32 %v786_v29, %v2223_v6  ;;  %v881_v29 = vadd.f32 %v880_v19, %v2264_v17  ;;  %v1002_v17 = vmax.f32 %v2299_v55, 0.0  ;;  %v994_v55 = vmax.f32 %v2275_v40, 0.0 }
 0x277   :  { %v845_v46 = vpop.f32.mrf.mxu3 }
 0x27c   :  { %977 = vmatmul.f32.gmra.mxu3 %v2210_v60  ;;  %v784_v60 = vadd.f32 %v783_v23, %v2212_v21  ;;  %v840_v23 = vadd.f32 %v839_v49, %v775_v9  ;;  %v1004_v49 = vmax.f32 %v2304_v63, 0.0  ;;  %v996_v63 = vmax.f32 %v2282_v54, 0.0 }
 0x27f   :  { %v848_v5 = vpop.f32.mrf.mxu3 }
 0x280   :  { %v849_v45 = vadd.f32 %v848_v5, %v784_v60 }
 0x282   :  { %v1014_v32 = vmax.f32 %v849_v45, 0.0 }
 0x284   :  { %980 = vmatmul.f32.gmra.mxu3 %v2221_v41  ;;  %v781_v41 = vadd.f32 %v780_v20, %v2236_v37  ;;  %v772_v20 = vadd.f32 %v2278_v8, %v2250_v58  ;;  %v1008_v8 = vmax.f32 %v840_v23, 0.0 }
 0x286   :  { %v846_v50 = vadd.f32 %v845_v46, %v781_v41 }
 0x287   :  { %v851_v2 = vpop.f32.mrf.mxu3 }
 0x288   :  { %v852_v31 = vadd.f32 %v851_v2, %v787_v7  ;;  %v1012_v14 = vmax.f32 %v846_v50, 0.0 }
 0x28a   :  { %v1016_v39 = vmax.f32 %v852_v31, 0.0 }
 0x28c   :  { %983 = vmatmul.f32.gmra.mxu3 %v2234_v35  ;;  %v886_v35 = vpop.f32.mrf.mxu2 }
 0x28f   :  { %v854_v43 = vpop.f32.mrf.mxu3 }
 0x290   :  { %v855_v59 = vadd.f32 %v854_v43, %v790_v28  ;;  %v998_v43 = vmax.f32 %v2289_v22, 0.0  ;;  %v990_v22 = vmax.f32 %v2261_v4, 0.0 }
 0x292   :  { %v1018_v15 = vmax.f32 %v855_v59, 0.0 }
 0x294   :  { %986 = vmatmul.f32.gmra.mxu3 %v2247_v57  ;;  %v878_v57 = vadd.f32 %v877_v44, %v2255_v26  ;;  %v837_v26 = vadd.f32 %v836_v10, %v772_v20  ;;  %v889_v47 = vpop.f32.mrf.mxu2  ;;  %v884_v10 = vadd.f32 %v883_v27, %v2271_v38  ;;  %v1000_v44 = vmax.f32 %v2294_v30, 0.0  ;;  %v2386_v20 = vld [vmem:[%s2493_s4] sm:$0xff] }
 0x295   :  { %v887_v38 = vadd.f32 %v886_v35, %v2241_v12  ;;  %v992_v30 = vmax.f32 %v2268_v48, 0.0  ;;  %v890_v54 = vadd.f32 %v889_v47, %v2252_v24 }
 0x296   :  { %v1006_v46 = vmax.f32 %v837_v26, 0.0  ;;  %v2399_v26 = vld [vmem:[%s2492_s3 + $0x10] sm:$0xff] }
 0x297   :  { %v857_v42 = vpop.f32.mrf.mxu3 }
 0x298   :  { %v858_v52 = vadd.f32 %v857_v42, %v793_v3 }
 0x29a   :  { %v1020_v53 = vmax.f32 %v858_v52, 0.0 }
 0x29c   :  { %1062 = vmatpush.msrb.mxu0 %v1020_v53  ;;  %1331 = vmatpush.msra.mxu2 %v1020_v53  ;;  %v892_v2 = vpop.f32.mrf.mxu2 }
 0x29d   :  { %v893_v42 = vadd.f32 %v892_v2, %v2259_v34  ;;  %v1392_v2 = vld [vmem:[%s2493_s4 + $0x38] sm:$0xff] }
 0x29e   :  { %1063 = vmatpush.msrb.mxu0 %v1018_v15  ;;  %1332 = vmatpush.msra.mxu2 %v1018_v15 }
 0x29f   :  { %v942_v18 = vpop.f32.mrf.mxu3 }
 0x2a0   :  { %v2328_v62 = vadd.f32 %v942_v18, %v878_v57  ;;  %1064 = vmatpush.msrb.mxu0 %v1016_v39  ;;  %1333 = vmatpush.msra.mxu2 %v1016_v39  ;;  %v2381_v18 = vld [vmem:[%s2492_s3 + $0x8] sm:$0xff] }
 0x2a2   :  { %1065 = vmatpush.msrb.mxu0 %v1014_v32  ;;  %1334 = vmatpush.msra.mxu2 %v1014_v32  ;;  %v1388_v32 = vld [vmem:[%s2493_s4 + $0x8] sm:$0xff] }
 0x2a4   :  { %1066 = vmatpush.msrb.mxu0 %v1012_v14  ;;  %1335 = vmatpush.msra.mxu2 %v1012_v14  ;;  %v895_v3 = vpop.f32.mrf.mxu2 }
 0x2a5   :  { %v896_v59 = vadd.f32 %v895_v3, %v2228_v16 }
 0x2a6   :  { %1067 = vmatpush.msrb.mxu0 %v1010_v33  ;;  %1336 = vmatpush.msra.mxu2 %v1010_v33  ;;  %v1389_v33 = vld [vmem:[%s2493_s4 + $0x18] sm:$0xff] }
 0x2a7   :  { %v945_v0 = vpop.f32.mrf.mxu3 }
 0x2a8   :  { %v2331_v56 = vadd.f32 %v945_v0, %v881_v29  ;;  %1068 = vmatpush.msrb.mxu0 %v1008_v8  ;;  %1337 = vmatpush.msra.mxu2 %v1008_v8  ;;  %v1390_v29 = vld [vmem:[%s2493_s4 + $0x20] sm:$0xff]  ;;  %v2411_v8 = vld [vmem:[%s2492_s3 + $0x18] sm:$0xff]  ;;  %v1423_v0 = vmov 4  }
 0x2aa   :  { %1069 = vmatpush.msrb.mxu0 %v1006_v46  ;;  %1338 = vmatpush.msra.mxu2 %v1006_v46 }
 0x2ac   :  { %1070 = vmatpush.msrb.mxu0 %v1004_v49  ;;  %1339 = vmatpush.msra.mxu2 %v1004_v49  ;;  %v898_v40 = vpop.f32.mrf.mxu2  ;;  %v2418_v49 = vld [vmem:[%s2492_s3 + $0x30] sm:$0xff] }
 0x2ad   :  { %v899_v4 = vadd.f32 %v898_v40, %v2239_v13  ;;  %v2373_v13 = vld [vmem:[%s2492_s3] sm:$0xff] }
 0x2ae   :  { %1071 = vmatpush.msrb.mxu0 %v1002_v17  ;;  %1340 = vmatpush.msra.mxu2 %v1002_v17  ;;  %v2424_v17 = vld [vmem:[%s2492_s3 + $0x20] sm:$0xff] }
 0x2af   :  { %v948_v5 = vpop.f32.mrf.mxu3 }
 0x2b0   :  { %v2337_v19 = vadd.f32 %v948_v5, %v884_v10  ;;  %1072 = vmatpush.msrb.mxu0 %v1000_v44  ;;  %1341 = vmatpush.msra.mxu2 %v1000_v44  ;;  %v1391_v44 = vld [vmem:[%s2493_s4 + $0x28] sm:$0xff] }
 0x2b2   :  { %1073 = vmatpush.msrb.mxu0 %v998_v43  ;;  %1342 = vmatpush.msra.mxu2 %v998_v43 }
 0x2b4   :  { %1074 = vmatpush.msrb.mxu0 %v996_v63  ;;  %1343 = vmatpush.msra.mxu2 %v996_v63  ;;  %v901_v52 = vpop.f32.mrf.mxu2  ;;  %v2437_v63 = vld [vmem:[%s2492_s3 + $0x38] sm:$0xff] }
 0x2b5   :  { %v902_v36 = vadd.f32 %v901_v52, %v2250_v58  ;;  %v1422_v58 = vmov 2  }
 0x2b6   :  { %1075 = vmatpush.msrb.mxu0 %v994_v55  ;;  %1344 = vmatpush.msra.mxu2 %v994_v55 }
 0x2b7   :  { %v951_v27 = vpop.f32.mrf.mxu3  ;;  %1375 = vset.pattern.permute.xlu1 %v1422_v58  ;;  %1377 = vset.pattern.permute.xlu0 %v1422_v58 }
 0x2b8   :  { %v2344_v28 = vadd.f32 %v951_v27, %v887_v38  ;;  %1076 = vmatpush.msrb.mxu0 %v992_v30  ;;  %1345 = vmatpush.msra.mxu2 %v992_v30  ;;  %v2445_v27 = vld [vmem:[%s2492_s3 + $0x28] sm:$0xff]  ;;  %s1425_s3 = smov [#allocation2]  }
 0x2b9   :  { %1031 = vperm.xlu1 %1375, %v2386_v20   ;;  %1039 = vperm.xlu0 %1377, %v1387_v25  }
 0x2ba   :  { %1077 = vmatpush.msrb.mxu0 %v990_v22  ;;  %1346 = vmatpush.msra.mxu2 %v990_v22 }
 0x2bb   :  { %1078 = vmatmul.f32.vlgmr.msrb.gmra.mxu0 %v2373_v13  ;;  %1376 = vset.pattern.permute.xlu2 %v1422_v58 }
 0x2bc   :  { %v2357_v35 = vpop.f32.mrf.mxu2  ;;  %1035 = vperm.xlu2 %1376, %v1388_v32   ;;  %1096 = vmatmul.f32.vlgmr.msra.gmra.mxu2 %v2418_v49 }
 0x2bf   :  { %v954_v7 = vpop.f32.mrf.mxu3 }
 0x2c0   :  { %v2348_v12 = vadd.f32 %v954_v7, %v890_v54 }
 0x2c1   :  { %1043 = vperm.xlu1 %1375, %v1389_v33   ;;  %1380 = vset.pattern.permute.xlu0 %v1423_v0 }
 0x2c2   :  { %1169 = vperm.xlu0 %1380, %v1387_v25  }
 0x2c3   :  { %1081 = vmatmul.f32.gmra.mxu0 %v2381_v18 }
 0x2c4   :  { %v2364_v15 = vpop.f32.mrf.mxu2  ;;  %1047 = vperm.xlu2 %1376, %v1390_v29   ;;  %1099 = vmatmul.f32.gmra.mxu2 %v2437_v63 }
 0x2c5   :  { %v908_v40 = vadd.f32 %v2364_v15, %v2225_v1 }
 0x2c7   :  { %v957_v60 = vpop.f32.mrf.mxu3 }
 0x2c8   :  { %v2351_v48 = vadd.f32 %v957_v60, %v893_v42 }
 0x2c9   :  { %1378 = vset.pattern.permute.xlu1 %v1423_v0 }
 0x2ca   :  { %1161 = vperm.xlu1 %1378, %v2386_v20   ;;  %1382 = vset.pattern.permute.xlu0 %v1422_v58  ;;  %v1001_v15 = vmax.f32 %v2351_v48, 0.0  ;;  %v991_v48 = vmax.f32 %v2328_v62, 0.0 }
 0x2cb   :  { %1084 = vmatmul.f32.gmra.mxu0 %v2399_v26  ;;  %1059 = vperm.xlu0 %1382, %v1392_v2  }
 0x2cc   :  { %v910_v16 = vpop.f32.mrf.mxu2  ;;  %1379 = vset.pattern.permute.xlu2 %v1423_v0 }
 0x2cd   :  { %1165 = vperm.xlu2 %1379, %v1388_v32   ;;  %v911_v54 = vadd.f32 %v910_v16, %v2236_v37 }
 0x2cf   :  { %v960_v41 = vpop.f32.mrf.mxu3 }
 0x2d0   :  { %v2354_v31 = vadd.f32 %v960_v41, %v896_v59 }
 0x2d2   :  { %1381 = vset.pattern.permute.xlu1 %v1422_v58 }
 0x2d3   :  { %1087 = vmatmul.f32.gmra.mxu0 %v2411_v8  ;;  %1051 = vperm.xlu1 %1381, %v1391_v44  }
 0x2d4   :  { %v913_v50 = vpop.f32.mrf.mxu2 }
 0x2d5   :  { %1173 = vperm.xlu2 %1379, %v1389_v33   ;;  %v914_v22 = vadd.f32 %v913_v50, %v2212_v21  ;;  %v905_v21 = vadd.f32 %v2357_v35, %v2214_v51 }
 0x2d7   :  { %v963_v53 = vpop.f32.mrf.mxu3 }
 0x2d8   :  { %v2359_v24 = vadd.f32 %v963_v53, %v899_v4 }
 0x2db   :  { %1090 = vmatmul.f32.gmra.mxu0 %v2424_v17 }
 0x2dc   :  { %v916_v14 = vpop.f32.mrf.mxu2 }
 0x2dd   :  { %v917_v38 = vadd.f32 %v916_v14, %v2223_v6  ;;  %1177 = vperm.xlu2 %1379, %v1390_v29  }
 0x2df   :  { %v966_v45 = vpop.f32.mrf.mxu3 }
 0x2e0   :  { %v2362_v34 = vadd.f32 %v966_v45, %v902_v36  ;;  %v1005_v36 = vmax.f32 %v2359_v24, 0.0  ;;  %v1003_v45 = vmax.f32 %v2354_v31, 0.0  ;;  %v995_v24 = vmax.f32 %v2337_v19, 0.0 }
 0x2e1   :  { %v993_v31 = vmax.f32 %v2331_v56, 0.0  ;;  %v1424_v19 = vmov 3  }
 0x2e2   :  { %v1007_v35 = vmax.f32 %v2362_v34, 0.0  ;;  %v997_v34 = vmax.f32 %v2344_v28, 0.0  ;;  %1385 = vset.pattern.permute.xlu0 %v1424_v19 }
 0x2e3   :  { %1093 = vmatmul.f32.gmra.mxu0 %v2445_v27 }
 0x2e4   :  { %v919_v46 = vpop.f32.mrf.mxu2 }
 0x2e5   :  { %v920_v43 = vadd.f32 %v919_v46, %v2203_v61 }
 0x2e7   :  { %v2366_v57 = vpop.f32.mrf.mxu3 }
 0x2e8   :  { %v970_v4 = vadd.f32 %v2366_v57, %v905_v21  ;;  %v999_v57 = vmax.f32 %v2348_v12, 0.0 }
 0x2ea   :  { %v1009_v51 = vmax.f32 %v970_v4, 0.0 }
 0x2ec   :  { %v922_v5 = vpop.f32.mrf.mxu2 }
 0x2ed   :  { %v923_v55 = vadd.f32 %v922_v5, %v2195_v11  ;;  %v1393_v11 = vld [vmem:[%s2493_s4 + $0x30] sm:$0xff]  ;;  %s1256_s4 = sshll.u32 %s1425_s3, 4  ;;  %s1257_s4 = int_to_ptr.vmem [resolvable:$true] %s1256_s4 }
 0x2ee   :  { %1055 = vperm.xlu1 %1381, %v1393_v11   ;;  %1185 = vperm.xlu2 %1379, %v1393_v11  }
 0x2ef   :  { %v2368_v9 = vpop.f32.mrf.mxu3 }
 0x2f0   :  { %v973_v52 = vadd.f32 %v2368_v9, %v908_v40 }
 0x2f2   :  { %v1011_v53 = vmax.f32 %v973_v52, 0.0 }
 0x2f6   :  { %1383 = vset.pattern.permute.xlu1 %v1423_v0  ;;  %1384 = vset.pattern.permute.xlu2 %v1424_v19 }
 0x2f7   :  { %v2376_v39 = vpop.f32.mrf.mxu3  ;;  %1181 = vperm.xlu1 %1383, %v1391_v44   ;;  %1235 = vperm.xlu2 %1384, %v2386_v20  }
 0x2f8   :  { %v976_v37 = vadd.f32 %v2376_v39, %v911_v54 }
 0x2fa   :  { %v1013_v1 = vmax.f32 %v976_v37, 0.0 }
 0x2ff   :  { %v978_v23 = vpop.f32.mrf.mxu3  ;;  %1189 = vperm.xlu1 %1383, %v1392_v2  }
 0x300   :  { %v979_v42 = vadd.f32 %v978_v23, %v914_v22 }
 0x302   :  { %v1015_v41 = vmax.f32 %v979_v42, 0.0 }
 0x307   :  { %v981_v47 = vpop.f32.mrf.mxu3 }
 0x308   :  { %v982_v7 = vadd.f32 %v981_v47, %v917_v38 }
 0x30a   :  { %v1017_v59 = vmax.f32 %v982_v7, 0.0 }
 0x30f   :  { %v984_v10 = vpop.f32.mrf.mxu3 }
 0x310   :  { %v985_v61 = vadd.f32 %v984_v10, %v920_v43 }
 0x312   :  { %v1019_v60 = vmax.f32 %v985_v61, 0.0 }
 0x316   :  { %v1036_v12 = vpop.permute.xlu2 %1035 }
 0x317   :  { %v987_v30 = vpop.f32.mrf.mxu3 }
 0x318   :  { %v988_v3 = vadd.f32 %v987_v30, %v923_v55 }
 0x31a   :  { %v1021_v6 = vmax.f32 %v988_v3, 0.0 }
 0x31c   :  { %1103 = vmatpush.msrb.mxu1 %v1021_v6  ;;  %1347 = vmatpush.msra.mxu3 %v1021_v6 }
 0x31e   :  { %1104 = vmatpush.msrb.mxu1 %v1019_v60  ;;  %1348 = vmatpush.msra.mxu3 %v1019_v60 }
 0x320   :  { %1105 = vmatpush.msrb.mxu1 %v1017_v59  ;;  %1349 = vmatpush.msra.mxu3 %v1017_v59 }
 0x322   :  { %1106 = vmatpush.msrb.mxu1 %v1015_v41  ;;  %1350 = vmatpush.msra.mxu3 %v1015_v41 }
 0x324   :  { %1107 = vmatpush.msrb.mxu1 %v1013_v1  ;;  %1351 = vmatpush.msra.mxu3 %v1013_v1 }
 0x326   :  { %1108 = vmatpush.msrb.mxu1 %v1011_v53  ;;  %1352 = vmatpush.msra.mxu3 %v1011_v53 }
 0x328   :  { %1109 = vmatpush.msrb.mxu1 %v1009_v51  ;;  %1353 = vmatpush.msra.mxu3 %v1009_v51 }
 0x32a   :  { %1110 = vmatpush.msrb.mxu1 %v1007_v35  ;;  %1354 = vmatpush.msra.mxu3 %v1007_v35 }
 0x32b   :  { %v1032_v56 = vpop.permute.xlu1 %1031  ;;  %v1040_v23 = vpop.permute.xlu0 %1039 }
 0x32c   :  { %1111 = vmatpush.msrb.mxu1 %v1005_v36  ;;  %1355 = vmatpush.msra.mxu3 %v1005_v36 }
 0x32e   :  { %1112 = vmatpush.msrb.mxu1 %v1003_v45  ;;  %1356 = vmatpush.msra.mxu3 %v1003_v45 }
 0x330   :  { %1113 = vmatpush.msrb.mxu1 %v1001_v15  ;;  %1357 = vmatpush.msra.mxu3 %v1001_v15 }
 0x332   :  { %1114 = vmatpush.msrb.mxu1 %v999_v57  ;;  %1358 = vmatpush.msra.mxu3 %v999_v57 }
 0x333   :  { %v1044_v16 = vpop.permute.xlu1 %1043 }
 0x334   :  { %1115 = vmatpush.msrb.mxu1 %v997_v34  ;;  %1359 = vmatpush.msra.mxu3 %v997_v34  ;;  %v1170_v44 = vpop.permute.xlu0 %1169 }
 0x336   :  { %1116 = vmatpush.msrb.mxu1 %v995_v24  ;;  %1360 = vmatpush.msra.mxu3 %v995_v24 }
 0x338   :  { %1117 = vmatpush.msrb.mxu1 %v993_v31  ;;  %1361 = vmatpush.msra.mxu3 %v993_v31  ;;  %v1079_v62 = vpop.f32.mrf.mxu0 }
 0x339   :  { %v1080_v20 = vadd.f32 %v1079_v62, %v1032_v56 }
 0x33a   :  { %1118 = vmatpush.msrb.mxu1 %v991_v48  ;;  %1362 = vmatpush.msra.mxu3 %v991_v48 }
 0x33b   :  { %1119 = vmatmul.f32.vlgmr.msrb.gmra.mxu1 %v2373_v13  ;;  %1137 = vmatmul.f32.vlgmr.msra.gmra.mxu3 %v2418_v49  ;;  %v1048_v13 = vpop.permute.xlu2 %1047 }
 0x33c   :  { %v2478_v50 = vpop.permute.xlu1 %1161 }
 0x33d   :  { %v1060_v60 = vpop.permute.xlu0 %1059 }
 0x33f   :  { %v1097_v38 = vpop.f32.mrf.mxu2 }
 0x340   :  { %v1082_v28 = vpop.f32.mrf.mxu0 }
 0x341   :  { %v1083_v25 = vadd.f32 %v1082_v28, %v1036_v12 }
 0x343   :  { %1122 = vmatmul.f32.gmra.mxu1 %v2381_v18  ;;  %1140 = vmatmul.f32.gmra.mxu3 %v2437_v63  ;;  %v1166_v58 = vpop.permute.xlu2 %1165  ;;  %v1146_v33 = vmax.f32 %v1083_v25, 0.0 }
 0x345   :  { %v2480_v32 = vpop.permute.xlu1 %1051  ;;  %v1194_v46 = vmul.f32 %v1166_v58, %v1146_v33 }
 0x347   :  { %v1100_v37 = vpop.f32.mrf.mxu2 }
 0x348   :  { %v1085_v9 = vpop.f32.mrf.mxu0  ;;  %v1101_v1 = vadd.f32 %v1100_v37, %v1060_v60 }
 0x349   :  { %v1086_v29 = vadd.f32 %v1085_v9, %v1040_v23 }
 0x34a   :  { %v1158_v34 = vmax.f32 %v1101_v1, 0.0 }
 0x34b   :  { %1125 = vmatmul.f32.gmra.mxu1 %v2399_v26  ;;  %v1144_v26 = vmax.f32 %v1080_v20, 0.0  ;;  %v1148_v10 = vmax.f32 %v1086_v29, 0.0 }
 0x34d   :  { %v1192_v0 = vmul.f32 %v2478_v50, %v1144_v26  ;;  %v1196_v63 = vmul.f32 %v1170_v44, %v1148_v10 }
 0x34f   :  { %v1208_v5 = vadd.f32 %v1194_v46, %v1192_v0 }
 0x350   :  { %v1088_v39 = vpop.f32.mrf.mxu0 }
 0x351   :  { %v1089_v49 = vadd.f32 %v1088_v39, %v1044_v16  ;;  %v1209_v61 = vadd.f32 %v1208_v5, %v1196_v63 }
 0x353   :  { %1128 = vmatmul.f32.gmra.mxu1 %v2411_v8  ;;  %v1174_v8 = vpop.permute.xlu2 %1173  ;;  %v1150_v2 = vmax.f32 %v1089_v49, 0.0 }
 0x358   :  { %v1091_v14 = vpop.f32.mrf.mxu0 }
 0x359   :  { %v1092_v43 = vadd.f32 %v1091_v14, %v1048_v13 }
 0x35b   :  { %1131 = vmatmul.f32.gmra.mxu1 %v2424_v17  ;;  %v1152_v22 = vmax.f32 %v1092_v43, 0.0  ;;  %v1178_v3 = vpop.permute.xlu2 %1177 }
 0x35d   :  { %v1200_v6 = vmul.f32 %v1178_v3, %v1152_v22 }
 0x360   :  { %v1056_v17 = vpop.permute.xlu1 %1055  ;;  %v1094_v55 = vpop.f32.mrf.mxu0 }
 0x361   :  { %v1095_v54 = vadd.f32 %v1094_v55, %v2480_v32  ;;  %v1098_v42 = vadd.f32 %v1097_v38, %v1056_v17 }
 0x363   :  { %1134 = vmatmul.f32.gmra.mxu1 %v2445_v27  ;;  %v1198_v27 = vmul.f32 %v1174_v8, %v1150_v2  ;;  %v1154_v40 = vmax.f32 %v1095_v54, 0.0  ;;  %v1156_v4 = vmax.f32 %v1098_v42, 0.0  ;;  %v1186_v53 = vpop.permute.xlu2 %1185  ;;  %v1246_v42 = vlaneseq }
 0x365   :  { %v1210_v7 = vadd.f32 %v1209_v61, %v1198_v27  ;;  %v1204_v24 = vmul.f32 %v1186_v53, %v1156_v4  ;;  %vm1248_vm2 = vcmp.lt.s32.totalorder %v1246_v42, 256 }
 0x367   :  { %v1211_v59 = vadd.f32 %v1210_v7, %v1200_v6 }
 0x369   :  { %v1182_v11 = vpop.permute.xlu1 %1181 }
 0x36a   :  { %v1202_v52 = vmul.f32 %v1182_v11, %v1154_v40 }
 0x36c   :  { %v1212_v45 = vadd.f32 %v1211_v59, %v1202_v52 }
 0x36e   :  { %v1213_v20 = vadd.f32 %v1212_v45, %v1204_v24 }
 0x371   :  { %v1190_v48 = vpop.permute.xlu1 %1189 }
 0x3b8   :  { %v1120_v18 = vpop.f32.mrf.mxu1 }
 0x3b9   :  { %v1121_v51 = vadd.f32 %v1120_v18, %v1032_v56 }
 0x3bb   :  { %v1145_v19 = vmax.f32 %v1121_v51, 0.0 }
 0x3bd   :  { %v1193_v25 = vmul.f32 %v2478_v50, %v1145_v19 }
 0x3be   :  { %v1138_v36 = vpop.f32.mrf.mxu3 }
 0x3bf   :  { %v1139_v33 = vadd.f32 %v1138_v36, %v1056_v17 }
 0x3c0   :  { %v1123_v47 = vpop.f32.mrf.mxu1 }
 0x3c1   :  { %v1124_v41 = vadd.f32 %v1123_v47, %v1036_v12  ;;  %v1206_v12 = vmul.f32 %v1190_v48, %v1158_v34 }
 0x3c3   :  { %v1147_v15 = vmax.f32 %v1124_v41, 0.0 }
 0x3c5   :  { %v1195_v9 = vmul.f32 %v1166_v58, %v1147_v15 }
 0x3c6   :  { %v1141_v18 = vpop.f32.mrf.mxu3 }
 0x3c7   :  { %v1142_v49 = vadd.f32 %v1141_v18, %v1060_v60  ;;  %v1236_v60 = vpop.permute.xlu2 %1235 }
 0x3c8   :  { %v1126_v30 = vpop.f32.mrf.mxu1 }
 0x3c9   :  { %v1127_v35 = vadd.f32 %v1126_v30, %v1040_v23  ;;  %v1221_v23 = vadd.f32 %v1195_v9, %v1193_v25  ;;  %v1159_v50 = vmax.f32 %v1142_v49, 0.0 }
 0x3cb   :  { %v1149_v62 = vmax.f32 %v1127_v35, 0.0 }
 0x3cd   :  { %v1197_v56 = vmul.f32 %v1170_v44, %v1149_v62 }
 0x3cf   :  { %v1222_v47 = vadd.f32 %v1221_v23, %v1197_v56 }
 0x3d0   :  { %v1129_v21 = vpop.f32.mrf.mxu1 }
 0x3d1   :  { %v1130_v57 = vadd.f32 %v1129_v21, %v1044_v16  ;;  %v1214_v16 = vadd.f32 %v1213_v20, %v1206_v12 }
 0x3d3   :  { %v1151_v39 = vmax.f32 %v1130_v57, 0.0  ;;  %v1215_v5 = vrot.slane %v1214_v16, 4 }
 0x3d5   :  { %v1199_v26 = vmul.f32 %v1174_v8, %v1151_v39  ;;  %v1216_v38 = vadd.f32 %v1215_v5, %v1214_v16  ;;  %v1207_v8 = vmul.f32 %v1190_v48, %v1159_v50 }
 0x3d7   :  { %v1223_v58 = vadd.f32 %v1222_v47, %v1199_v26  ;;  %v1217_v30 = vrot.slane %v1216_v38, 2 }
 0x3d8   :  { %v1132_v31 = vpop.f32.mrf.mxu1 }
 0x3d9   :  { %v1133_v28 = vadd.f32 %v1132_v31, %v1048_v13  ;;  %v1157_v13 = vmax.f32 %v1139_v33, 0.0  ;;  %v1218_v61 = vadd.f32 %v1217_v30, %v1216_v38 }
 0x3db   :  { %v1153_v14 = vmax.f32 %v1133_v28, 0.0  ;;  %v1205_v44 = vmul.f32 %v1186_v53, %v1157_v13 }
 0x3dd   :  { %v1201_v0 = vmul.f32 %v1178_v3, %v1153_v14 }
 0x3df   :  { %v1224_v2 = vadd.f32 %v1223_v58, %v1201_v0 }
 0x3e0   :  { %v1135_v29 = vpop.f32.mrf.mxu1 }
 0x3e1   :  { %v1136_v46 = vadd.f32 %v1135_v29, %v2480_v32  ;;  %v1219_v32 = vrot.slane %v1218_v61, 1 }
 0x3e3   :  { %v1155_v10 = vmax.f32 %v1136_v46, 0.0  ;;  %v1220_v6 = vadd.f32 %v1219_v32, %v1218_v61 }
 0x3e5   :  { %v1203_v43 = vmul.f32 %v1182_v11, %v1155_v10  ;;  %v1238_v21 = vadd.f32 %v1236_v60, %v1220_v6 }
 0x3e7   :  { %v1225_v63 = vadd.f32 %v1224_v2, %v1203_v43 }
 0x3e9   :  { %v1226_v55 = vadd.f32 %v1225_v63, %v1205_v44 }
 0x3eb   :  { %v1227_v17 = vadd.f32 %v1226_v55, %v1207_v8 }
 0x3ed   :  { %v1228_v27 = vrot.slane %v1227_v17, 4 }
 0x3ef   :  { %v1229_v22 = vadd.f32 %v1228_v27, %v1227_v17 }
 0x3f1   :  { %v1230_v3 = vrot.slane %v1229_v22, 2 }
 0x3f3   :  { %v1231_v54 = vadd.f32 %v1230_v3, %v1229_v22 }
 0x3f5   :  { %v1232_v7 = vrot.slane %v1231_v54, 1 }
 0x3f7   :  { %v1233_v40 = vadd.f32 %v1232_v7, %v1231_v54 }
 0x3f9   :  { %v1239_v11 = vadd.f32 %v1236_v60, %v1233_v40 }
 0x3fb   :  { %v1242_v37 = vrot.slane %v1239_v11, 7 }
 0x3fd   :  { %v1244_v59 = vsel %vm1243_vm1, %v1238_v21, %v1242_v37 }
 0x3fe   :  { %1250 = vst.msk [vmem:[#allocation2] sm:$0x3] %vm1248_vm2, %v1244_v59 }
 0x3ff   :  { %1261 = dma.vmem_to_hbm [thread:$0]  %s1257_s4, 32, %s1259_s8, [#allocation3]  }
 0x400   :  { %1418 = dma.done.wait [#allocation3], 32  }
 0x401   :  { %1419 = vsyncadd [#allocation3], 4294967264 }
 0x402   :  { %1266 = vsyncpa [#allocation3], 1 }

</bundles_post_ra>
